<compile_context>
chip_gen: v6e
topology: v6e:2x2x1
jax: 0.10.0
libtpu: 0.0.40
codegen_flags: <defaults>
</compile_context>

<pallas_src>
import math

import jax
import jax.numpy as jnp
from jax.experimental import pallas as pl
from jax.experimental.pallas import tpu as pltpu

N_COLORS = 16
N_CHARS = 256
N_SPECIALS = 256
VOCAB = N_COLORS + N_CHARS + N_SPECIALS          # 528


def _glyph_embed_kernel(idx_ref, tc_ref, tch_ref, ts_ref, bias_ref, out_ref):
    """One tile of tokens, G tokens packed per 128-wide output row.

    idx_ref : (G, R, 3) int32  per-field indices (colors, chars, specials)
    tc_ref  : (16,  dim) bf16  Emb_colors   @ Wl[:dim]
    tch_ref : (256, dim) bf16  Emb_chars    @ Wl[dim:2*dim]
    ts_ref  : (256, dim) bf16  Emb_specials @ Wl[2*dim:]
    bias_ref: (1, dim)   f32
    out_ref : (R, G*dim) f32   token (row*G + g) lives in lane slice g
    """
    G, R, _ = idx_ref.shape
    dim = tc_ref.shape[1]

    # Per-field sub-range iotas, shared by every lane group (chars/specials
    # share the same 256-wide iota).
    iota_c = jax.lax.broadcasted_iota(jnp.int32, (R, N_COLORS), 1)
    iota_256 = jax.lax.broadcasted_iota(jnp.int32, (R, N_CHARS), 1)
    bias = bias_ref[...]                             # (1, dim), hoisted

    for g in range(G):                               # static unroll, G <= 4
        idx = idx_ref[g]                             # (R, 3) int32
        oh_c = (iota_c == idx[:, 0:1]).astype(jnp.bfloat16)      # (R, 16)
        oh_ch = (iota_256 == idx[:, 1:2]).astype(jnp.bfloat16)   # (R, 256)
        oh_s = (iota_256 == idx[:, 2:3]).astype(jnp.bfloat16)    # (R, 256)

        # Chained accumulation of the three field matmuls (MRB-friendly on v7x).
        acc = jnp.dot(oh_c, tc_ref[...], preferred_element_type=jnp.float32)
        acc += jnp.dot(oh_ch, tch_ref[...], preferred_element_type=jnp.float32)
        acc += jnp.dot(oh_s, ts_ref[...], preferred_element_type=jnp.float32)

        # Cheap 32-lane VMEM sub-store; HBM writeback of the full (R, 128)
        # block stays lane-dense and unmasked.
        out_ref[:, g * dim:(g + 1) * dim] = acc + bias


def glyph_embedding_forward(colors, chars, specials, params, *, dim,
                            tokens_per_tile=4096):
    """colors/chars/specials: (TB, H, W) int arrays. Returns (TB, H, W, dim) f32."""
    wc, wch, ws, wl_t, bl = params            # wl_t: (3*dim, dim), bl: (dim,)
    TB, H, W = colors.shape
    n = TB * H * W

    # --- lane packing factor: G tokens per 128-wide output row --------------
    if dim % 128 == 0:
        G = 1                                 # already lane-dense
    elif 128 % dim == 0:
        G = 128 // dim
    else:
        G = 1  # TODO(synk): non-divisor dims fall back to masked (tile, dim) stores
    dout = G * dim
    unit = 8 * G                              # rows-per-step granularity

    tile = max(int(tokens_per_tile), unit)
    tile = int(math.ceil(tile / unit) * unit)          # R multiple of 8
    # Guarantee >= 2 grid steps on small inputs so v7x's 2nd TensorCore works.
    half = int(math.ceil(n / (2 * unit)) * unit)
    if unit <= half < tile:
        tile = half
    n_pad = int(math.ceil(n / tile) * tile)
    nr = n_pad // G                                     # output rows
    r = tile // G                                       # output rows per step

    # --- fold the nn.Linear into the embedding tables (offline), cast bf16 --
    f32 = jnp.float32
    tc = (wc.astype(f32) @ wl_t[:dim].astype(f32)).astype(jnp.bfloat16)
    tch = (wch.astype(f32) @ wl_t[dim:2 * dim].astype(f32)).astype(jnp.bfloat16)
    ts = (ws.astype(f32) @ wl_t[2 * dim:].astype(f32)).astype(jnp.bfloat16)
    bias = bl.reshape(1, dim).astype(f32)

    # --- pack per-field indices into one (G, nr, 3) int32 array -------------
    idx = jnp.stack(
        [colors.reshape(-1), chars.reshape(-1), specials.reshape(-1)],
        axis=-1).astype(jnp.int32)
    idx = jnp.pad(idx, ((0, n_pad - n), (0, 0)))        # padded tail -> row-0 lookups
    idx = idx.reshape(nr, G, 3).transpose(1, 0, 2)      # [g, row] = token row*G + g

    grid = (n_pad // tile,)

    out = pl.pallas_call(
        _glyph_embed_kernel,
        out_shape=jax.ShapeDtypeStruct((nr, dout), jnp.float32),
        grid_spec=pltpu.PrefetchScalarGridSpec(
            num_scalar_prefetch=0,
            grid=grid,
            in_specs=[
                pl.BlockSpec((G, r, 3), lambda i: (0, i, 0)),        # packed indices
                pl.BlockSpec((N_COLORS, dim), lambda i: (0, 0)),     # colors table (resident)
                pl.BlockSpec((N_CHARS, dim), lambda i: (0, 0)),      # chars table (resident)
                pl.BlockSpec((N_SPECIALS, dim), lambda i: (0, 0)),   # specials table (resident)
                pl.BlockSpec((1, dim), lambda i: (0, 0)),            # bias (resident)
            ],
            out_specs=pl.BlockSpec((r, dout), lambda i: (i, 0)),
        ),
        compiler_params=pltpu.CompilerParams(
            dimension_semantics=("parallel",),          # shards across v7x's 2 TCs
            vmem_limit_bytes=48 * 1024 * 1024),         # explicit, v7x-safe budget
        cost_estimate=pl.CostEstimate(
            flops=2 * n_pad * VOCAB * dim,              # matches executed MXU work
            transcendentals=0,
            bytes_accessed=n_pad * (3 * 4 + dim * 4) + VOCAB * dim * 2),
    )(idx, tc, tch, ts, bias)

    # Undo lane packing: (nr, G*dim) row-major == (n_pad, dim) row-major.
    out = out.reshape(n_pad, dim)[:n]
    return out.reshape(TB, H, W, dim)


def reference_forward(colors, chars, specials, params):
    """Pure-JAX f32 reference mirroring the PyTorch forward (gather+concat+linear)."""
    wc, wch, ws, wl_t, bl = params
    e = jnp.concatenate(
        [jnp.take(wc, colors, axis=0),
         jnp.take(wch, chars, axis=0),
         jnp.take(ws, specials, axis=0)], axis=-1)
    return e @ wl_t + bl


def init_params(key, dim):
    kc, kch, ks, kw, kb = jax.random.split(key, 5)
    # nn.Embedding default init: N(0, 1)
    wc = jax.random.normal(kc, (N_COLORS, dim), jnp.float32)
    wch = jax.random.normal(kch, (N_CHARS, dim), jnp.float32)
    ws = jax.random.normal(ks, (N_SPECIALS, dim), jnp.float32)
    # nn.Linear default init: U(+-1/sqrt(fan_in)); fan_in = 3*dim
    bound = 1.0 / math.sqrt(3 * dim)
    wl = jax.random.uniform(kw, (dim, 3 * dim), jnp.float32, -bound, bound)
    bl = jax.random.uniform(kb, (dim,), jnp.float32, -bound, bound)
    # kernel/reference consume W^T (in_features, out_features) and a (dim,) bias
    return wc, wch, ws, wl.T, bl


if __name__ == "__main__":
    # Small shapes: T=2, B=2 -> TB=4 (module flattens (T,B) -> T*B), H=8, W=16, dim=32
    T, B, H, W, DIM = 2, 2, 8, 16, 32
    TB = T * B

    key = jax.random.PRNGKey(0)
    k_idx, k_par = jax.random.split(key)
    kc, kch, ks = jax.random.split(k_idx, 3)

    colors = jax.random.randint(kc, (TB, H, W), 0, N_COLORS, jnp.int32)
    chars = jax.random.randint(kch, (TB, H, W), 0, N_CHARS, jnp.int32)
    specials = jax.random.randint(ks, (TB, H, W), 0, N_SPECIALS, jnp.int32)

    params = init_params(k_par, DIM)

    out = glyph_embedding_forward(colors, chars, specials, params, dim=DIM)
    out = jax.block_until_ready(out)

    ref = reference_forward(colors, chars, specials, params)
    assert out.shape == (TB, H, W, DIM), out.shape
    max_err = float(jnp.max(jnp.abs(out - ref)))
    # bf16 rounding of the folded (Emb @ W) tables -> ~1e-3 relative error.
    assert jnp.allclose(out, ref, atol=2e-2, rtol=2e-2), max_err

    print("KERNEL_OK")
</pallas_src>

<mosaic_0001>
module attributes {stable_mosaic.version = 11 : i64} {
  func.func @_glyph_embed_kernel(%arg0: i32, %arg1: memref<4x64x3xi32, #tpu.memory_space<vmem>>, %arg2: memref<16x32xbf16, #tpu.memory_space<vmem>>, %arg3: memref<256x32xbf16, #tpu.memory_space<vmem>>, %arg4: memref<256x32xbf16, #tpu.memory_space<vmem>>, %arg5: memref<1x32xf32, #tpu.memory_space<vmem>>, %arg6: memref<64x128xf32, #tpu.memory_space<vmem>>) attributes {dimension_semantics = [#tpu.dimension_semantics<parallel>], iteration_bounds = array<i64: 2>, scalar_prefetch = 0 : i64, scratch_operands = 0 : i64, tpu.core_type = #tpu.core_type<tc>, window_params = [{transform_indices = @transform_0, window_bounds = array<i64: 4, 64, 3>}, {pipeline_mode = #tpu.pipeline_mode<synchronous>, transform_indices = @transform_1, window_bounds = array<i64: 16, 32>}, {pipeline_mode = #tpu.pipeline_mode<synchronous>, transform_indices = @transform_2, window_bounds = array<i64: 256, 32>}, {pipeline_mode = #tpu.pipeline_mode<synchronous>, transform_indices = @transform_3, window_bounds = array<i64: 256, 32>}, {pipeline_mode = #tpu.pipeline_mode<synchronous>, transform_indices = @transform_4, window_bounds = array<i64: 1, 32>}, {transform_indices = @transform_5, window_bounds = array<i64: 64, 128>}]} {
    %0 = tpu.iota {dimensions = array<i32: 1>} : vector<64x16xi32>
    %1 = tpu.iota {dimensions = array<i32: 1>} : vector<64x256xi32>
    %c0 = arith.constant 0 : index
    %c0_0 = arith.constant 0 : index
    %2 = vector.load %arg5[%c0, %c0_0] : memref<1x32xf32, #tpu.memory_space<vmem>>, vector<1x32xf32>
    %c0_1 = arith.constant 0 : index
    %c0_2 = arith.constant 0 : index
    %c0_3 = arith.constant 0 : index
    %3 = vector.load %arg1[%c0_1, %c0_2, %c0_3] : memref<4x64x3xi32, #tpu.memory_space<vmem>>, vector<1x64x3xi32>
    %4 = vector.shape_cast %3 : vector<1x64x3xi32> to vector<64x3xi32>
    %5 = vector.extract_strided_slice %4 {offsets = [0, 0], sizes = [64, 1], strides = [1, 1]} : vector<64x3xi32> to vector<64x1xi32>
    %6 = vector.broadcast %5 : vector<64x1xi32> to vector<64x16xi32>
    %7 = arith.cmpi eq, %0, %6 : vector<64x16xi32>
    %8 = arith.extui %7 : vector<64x16xi1> to vector<64x16xi32>
    %9 = arith.sitofp %8 : vector<64x16xi32> to vector<64x16xf32>
    %10 = arith.truncf %9 : vector<64x16xf32> to vector<64x16xbf16>
    %11 = vector.extract_strided_slice %4 {offsets = [0, 1], sizes = [64, 1], strides = [1, 1]} : vector<64x3xi32> to vector<64x1xi32>
    %12 = vector.broadcast %11 : vector<64x1xi32> to vector<64x256xi32>
    %13 = arith.cmpi eq, %1, %12 : vector<64x256xi32>
    %14 = arith.extui %13 : vector<64x256xi1> to vector<64x256xi32>
    %15 = arith.sitofp %14 : vector<64x256xi32> to vector<64x256xf32>
    %16 = arith.truncf %15 : vector<64x256xf32> to vector<64x256xbf16>
    %17 = vector.extract_strided_slice %4 {offsets = [0, 2], sizes = [64, 1], strides = [1, 1]} : vector<64x3xi32> to vector<64x1xi32>
    %18 = vector.broadcast %17 : vector<64x1xi32> to vector<64x256xi32>
    %19 = arith.cmpi eq, %1, %18 : vector<64x256xi32>
    %20 = arith.extui %19 : vector<64x256xi1> to vector<64x256xi32>
    %21 = arith.sitofp %20 : vector<64x256xi32> to vector<64x256xf32>
    %22 = arith.truncf %21 : vector<64x256xf32> to vector<64x256xbf16>
    %c0_4 = arith.constant 0 : index
    %c0_5 = arith.constant 0 : index
    %23 = vector.load %arg2[%c0_4, %c0_5] : memref<16x32xbf16, #tpu.memory_space<vmem>>, vector<16x32xbf16>
    %cst = arith.constant dense<0.000000e+00> : vector<64x32xf32>
    %24 = tpu.matmul %10, %23, %cst {dimension_numbers = #tpu.dot_dimension_numbers<[1], [0], [0], [1], [0, 0, 1, 1], [], []>} : vector<64x16xbf16>, vector<16x32xbf16>, vector<64x32xf32> -> vector<64x32xf32>
    %c0_6 = arith.constant 0 : index
    %c0_7 = arith.constant 0 : index
    %25 = vector.load %arg3[%c0_6, %c0_7] : memref<256x32xbf16, #tpu.memory_space<vmem>>, vector<256x32xbf16>
    %cst_8 = arith.constant dense<0.000000e+00> : vector<64x32xf32>
    %26 = tpu.matmul %16, %25, %cst_8 {dimension_numbers = #tpu.dot_dimension_numbers<[1], [0], [0], [1], [0, 0, 1, 1], [], []>} : vector<64x256xbf16>, vector<256x32xbf16>, vector<64x32xf32> -> vector<64x32xf32>
    %27 = arith.addf %24, %26 : vector<64x32xf32>
    %c0_9 = arith.constant 0 : index
    %c0_10 = arith.constant 0 : index
    %28 = vector.load %arg4[%c0_9, %c0_10] : memref<256x32xbf16, #tpu.memory_space<vmem>>, vector<256x32xbf16>
    %cst_11 = arith.constant dense<0.000000e+00> : vector<64x32xf32>
    %29 = tpu.matmul %22, %28, %cst_11 {dimension_numbers = #tpu.dot_dimension_numbers<[1], [0], [0], [1], [0, 0, 1, 1], [], []>} : vector<64x256xbf16>, vector<256x32xbf16>, vector<64x32xf32> -> vector<64x32xf32>
    %30 = arith.addf %27, %29 : vector<64x32xf32>
    %31 = vector.broadcast %2 : vector<1x32xf32> to vector<64x32xf32>
    %32 = arith.addf %30, %31 : vector<64x32xf32>
    %c0_12 = arith.constant 0 : index
    %c0_13 = arith.constant 0 : index
    %33 = vector.load %arg6[%c0_12, %c0_13] : memref<64x128xf32, #tpu.memory_space<vmem>>, vector<64x32xf32>
    tpu.vector_store %arg6[%c0_12, %c0_13], %32 {strides = array<i32>} : memref<64x128xf32, #tpu.memory_space<vmem>>, vector<64x32xf32>,
    %c1 = arith.constant 1 : index
    %c0_14 = arith.constant 0 : index
    %c0_15 = arith.constant 0 : index
    %34 = vector.load %arg1[%c1, %c0_14, %c0_15] : memref<4x64x3xi32, #tpu.memory_space<vmem>>, vector<1x64x3xi32>
    %35 = vector.shape_cast %34 : vector<1x64x3xi32> to vector<64x3xi32>
    %36 = vector.extract_strided_slice %35 {offsets = [0, 0], sizes = [64, 1], strides = [1, 1]} : vector<64x3xi32> to vector<64x1xi32>
    %37 = vector.broadcast %36 : vector<64x1xi32> to vector<64x16xi32>
    %38 = arith.cmpi eq, %0, %37 : vector<64x16xi32>
    %39 = arith.extui %38 : vector<64x16xi1> to vector<64x16xi32>
    %40 = arith.sitofp %39 : vector<64x16xi32> to vector<64x16xf32>
    %41 = arith.truncf %40 : vector<64x16xf32> to vector<64x16xbf16>
    %42 = vector.extract_strided_slice %35 {offsets = [0, 1], sizes = [64, 1], strides = [1, 1]} : vector<64x3xi32> to vector<64x1xi32>
    %43 = vector.broadcast %42 : vector<64x1xi32> to vector<64x256xi32>
    %44 = arith.cmpi eq, %1, %43 : vector<64x256xi32>
    %45 = arith.extui %44 : vector<64x256xi1> to vector<64x256xi32>
    %46 = arith.sitofp %45 : vector<64x256xi32> to vector<64x256xf32>
    %47 = arith.truncf %46 : vector<64x256xf32> to vector<64x256xbf16>
    %48 = vector.extract_strided_slice %35 {offsets = [0, 2], sizes = [64, 1], strides = [1, 1]} : vector<64x3xi32> to vector<64x1xi32>
    %49 = vector.broadcast %48 : vector<64x1xi32> to vector<64x256xi32>
    %50 = arith.cmpi eq, %1, %49 : vector<64x256xi32>
    %51 = arith.extui %50 : vector<64x256xi1> to vector<64x256xi32>
    %52 = arith.sitofp %51 : vector<64x256xi32> to vector<64x256xf32>
    %53 = arith.truncf %52 : vector<64x256xf32> to vector<64x256xbf16>
    %c0_16 = arith.constant 0 : index
    %c0_17 = arith.constant 0 : index
    %54 = vector.load %arg2[%c0_16, %c0_17] : memref<16x32xbf16, #tpu.memory_space<vmem>>, vector<16x32xbf16>
    %cst_18 = arith.constant dense<0.000000e+00> : vector<64x32xf32>
    %55 = tpu.matmul %41, %54, %cst_18 {dimension_numbers = #tpu.dot_dimension_numbers<[1], [0], [0], [1], [0, 0, 1, 1], [], []>} : vector<64x16xbf16>, vector<16x32xbf16>, vector<64x32xf32> -> vector<64x32xf32>
    %c0_19 = arith.constant 0 : index
    %c0_20 = arith.constant 0 : index
    %56 = vector.load %arg3[%c0_19, %c0_20] : memref<256x32xbf16, #tpu.memory_space<vmem>>, vector<256x32xbf16>
    %cst_21 = arith.constant dense<0.000000e+00> : vector<64x32xf32>
    %57 = tpu.matmul %47, %56, %cst_21 {dimension_numbers = #tpu.dot_dimension_numbers<[1], [0], [0], [1], [0, 0, 1, 1], [], []>} : vector<64x256xbf16>, vector<256x32xbf16>, vector<64x32xf32> -> vector<64x32xf32>
    %58 = arith.addf %55, %57 : vector<64x32xf32>
    %c0_22 = arith.constant 0 : index
    %c0_23 = arith.constant 0 : index
    %59 = vector.load %arg4[%c0_22, %c0_23] : memref<256x32xbf16, #tpu.memory_space<vmem>>, vector<256x32xbf16>
    %cst_24 = arith.constant dense<0.000000e+00> : vector<64x32xf32>
    %60 = tpu.matmul %53, %59, %cst_24 {dimension_numbers = #tpu.dot_dimension_numbers<[1], [0], [0], [1], [0, 0, 1, 1], [], []>} : vector<64x256xbf16>, vector<256x32xbf16>, vector<64x32xf32> -> vector<64x32xf32>
    %61 = arith.addf %58, %60 : vector<64x32xf32>
    %62 = vector.broadcast %2 : vector<1x32xf32> to vector<64x32xf32>
    %63 = arith.addf %61, %62 : vector<64x32xf32>
    %c0_25 = arith.constant 0 : index
    %c32 = arith.constant 32 : index
    %64 = vector.load %arg6[%c0_25, %c32] : memref<64x128xf32, #tpu.memory_space<vmem>>, vector<64x32xf32>
    tpu.vector_store %arg6[%c0_25, %c32], %63 {strides = array<i32>} : memref<64x128xf32, #tpu.memory_space<vmem>>, vector<64x32xf32>,
    %c2 = arith.constant 2 : index
    %c0_26 = arith.constant 0 : index
    %c0_27 = arith.constant 0 : index
    %65 = vector.load %arg1[%c2, %c0_26, %c0_27] : memref<4x64x3xi32, #tpu.memory_space<vmem>>, vector<1x64x3xi32>
    %66 = vector.shape_cast %65 : vector<1x64x3xi32> to vector<64x3xi32>
    %67 = vector.extract_strided_slice %66 {offsets = [0, 0], sizes = [64, 1], strides = [1, 1]} : vector<64x3xi32> to vector<64x1xi32>
    %68 = vector.broadcast %67 : vector<64x1xi32> to vector<64x16xi32>
    %69 = arith.cmpi eq, %0, %68 : vector<64x16xi32>
    %70 = arith.extui %69 : vector<64x16xi1> to vector<64x16xi32>
    %71 = arith.sitofp %70 : vector<64x16xi32> to vector<64x16xf32>
    %72 = arith.truncf %71 : vector<64x16xf32> to vector<64x16xbf16>
    %73 = vector.extract_strided_slice %66 {offsets = [0, 1], sizes = [64, 1], strides = [1, 1]} : vector<64x3xi32> to vector<64x1xi32>
    %74 = vector.broadcast %73 : vector<64x1xi32> to vector<64x256xi32>
    %75 = arith.cmpi eq, %1, %74 : vector<64x256xi32>
    %76 = arith.extui %75 : vector<64x256xi1> to vector<64x256xi32>
    %77 = arith.sitofp %76 : vector<64x256xi32> to vector<64x256xf32>
    %78 = arith.truncf %77 : vector<64x256xf32> to vector<64x256xbf16>
    %79 = vector.extract_strided_slice %66 {offsets = [0, 2], sizes = [64, 1], strides = [1, 1]} : vector<64x3xi32> to vector<64x1xi32>
    %80 = vector.broadcast %79 : vector<64x1xi32> to vector<64x256xi32>
    %81 = arith.cmpi eq, %1, %80 : vector<64x256xi32>
    %82 = arith.extui %81 : vector<64x256xi1> to vector<64x256xi32>
    %83 = arith.sitofp %82 : vector<64x256xi32> to vector<64x256xf32>
    %84 = arith.truncf %83 : vector<64x256xf32> to vector<64x256xbf16>
    %c0_28 = arith.constant 0 : index
    %c0_29 = arith.constant 0 : index
    %85 = vector.load %arg2[%c0_28, %c0_29] : memref<16x32xbf16, #tpu.memory_space<vmem>>, vector<16x32xbf16>
    %cst_30 = arith.constant dense<0.000000e+00> : vector<64x32xf32>
    %86 = tpu.matmul %72, %85, %cst_30 {dimension_numbers = #tpu.dot_dimension_numbers<[1], [0], [0], [1], [0, 0, 1, 1], [], []>} : vector<64x16xbf16>, vector<16x32xbf16>, vector<64x32xf32> -> vector<64x32xf32>
    %c0_31 = arith.constant 0 : index
    %c0_32 = arith.constant 0 : index
    %87 = vector.load %arg3[%c0_31, %c0_32] : memref<256x32xbf16, #tpu.memory_space<vmem>>, vector<256x32xbf16>
    %cst_33 = arith.constant dense<0.000000e+00> : vector<64x32xf32>
    %88 = tpu.matmul %78, %87, %cst_33 {dimension_numbers = #tpu.dot_dimension_numbers<[1], [0], [0], [1], [0, 0, 1, 1], [], []>} : vector<64x256xbf16>, vector<256x32xbf16>, vector<64x32xf32> -> vector<64x32xf32>
    %89 = arith.addf %86, %88 : vector<64x32xf32>
    %c0_34 = arith.constant 0 : index
    %c0_35 = arith.constant 0 : index
    %90 = vector.load %arg4[%c0_34, %c0_35] : memref<256x32xbf16, #tpu.memory_space<vmem>>, vector<256x32xbf16>
    %cst_36 = arith.constant dense<0.000000e+00> : vector<64x32xf32>
    %91 = tpu.matmul %84, %90, %cst_36 {dimension_numbers = #tpu.dot_dimension_numbers<[1], [0], [0], [1], [0, 0, 1, 1], [], []>} : vector<64x256xbf16>, vector<256x32xbf16>, vector<64x32xf32> -> vector<64x32xf32>
    %92 = arith.addf %89, %91 : vector<64x32xf32>
    %93 = vector.broadcast %2 : vector<1x32xf32> to vector<64x32xf32>
    %94 = arith.addf %92, %93 : vector<64x32xf32>
    %c0_37 = arith.constant 0 : index
    %c64 = arith.constant 64 : index
    %95 = vector.load %arg6[%c0_37, %c64] : memref<64x128xf32, #tpu.memory_space<vmem>>, vector<64x32xf32>
    tpu.vector_store %arg6[%c0_37, %c64], %94 {strides = array<i32>} : memref<64x128xf32, #tpu.memory_space<vmem>>, vector<64x32xf32>,
    %c3 = arith.constant 3 : index
    %c0_38 = arith.constant 0 : index
    %c0_39 = arith.constant 0 : index
    %96 = vector.load %arg1[%c3, %c0_38, %c0_39] : memref<4x64x3xi32, #tpu.memory_space<vmem>>, vector<1x64x3xi32>
    %97 = vector.shape_cast %96 : vector<1x64x3xi32> to vector<64x3xi32>
    %98 = vector.extract_strided_slice %97 {offsets = [0, 0], sizes = [64, 1], strides = [1, 1]} : vector<64x3xi32> to vector<64x1xi32>
    %99 = vector.broadcast %98 : vector<64x1xi32> to vector<64x16xi32>
    %100 = arith.cmpi eq, %0, %99 : vector<64x16xi32>
    %101 = arith.extui %100 : vector<64x16xi1> to vector<64x16xi32>
    %102 = arith.sitofp %101 : vector<64x16xi32> to vector<64x16xf32>
    %103 = arith.truncf %102 : vector<64x16xf32> to vector<64x16xbf16>
    %104 = vector.extract_strided_slice %97 {offsets = [0, 1], sizes = [64, 1], strides = [1, 1]} : vector<64x3xi32> to vector<64x1xi32>
    %105 = vector.broadcast %104 : vector<64x1xi32> to vector<64x256xi32>
    %106 = arith.cmpi eq, %1, %105 : vector<64x256xi32>
    %107 = arith.extui %106 : vector<64x256xi1> to vector<64x256xi32>
    %108 = arith.sitofp %107 : vector<64x256xi32> to vector<64x256xf32>
    %109 = arith.truncf %108 : vector<64x256xf32> to vector<64x256xbf16>
    %110 = vector.extract_strided_slice %97 {offsets = [0, 2], sizes = [64, 1], strides = [1, 1]} : vector<64x3xi32> to vector<64x1xi32>
    %111 = vector.broadcast %110 : vector<64x1xi32> to vector<64x256xi32>
    %112 = arith.cmpi eq, %1, %111 : vector<64x256xi32>
    %113 = arith.extui %112 : vector<64x256xi1> to vector<64x256xi32>
    %114 = arith.sitofp %113 : vector<64x256xi32> to vector<64x256xf32>
    %115 = arith.truncf %114 : vector<64x256xf32> to vector<64x256xbf16>
    %c0_40 = arith.constant 0 : index
    %c0_41 = arith.constant 0 : index
    %116 = vector.load %arg2[%c0_40, %c0_41] : memref<16x32xbf16, #tpu.memory_space<vmem>>, vector<16x32xbf16>
    %cst_42 = arith.constant dense<0.000000e+00> : vector<64x32xf32>
    %117 = tpu.matmul %103, %116, %cst_42 {dimension_numbers = #tpu.dot_dimension_numbers<[1], [0], [0], [1], [0, 0, 1, 1], [], []>} : vector<64x16xbf16>, vector<16x32xbf16>, vector<64x32xf32> -> vector<64x32xf32>
    %c0_43 = arith.constant 0 : index
    %c0_44 = arith.constant 0 : index
    %118 = vector.load %arg3[%c0_43, %c0_44] : memref<256x32xbf16, #tpu.memory_space<vmem>>, vector<256x32xbf16>
    %cst_45 = arith.constant dense<0.000000e+00> : vector<64x32xf32>
    %119 = tpu.matmul %109, %118, %cst_45 {dimension_numbers = #tpu.dot_dimension_numbers<[1], [0], [0], [1], [0, 0, 1, 1], [], []>} : vector<64x256xbf16>, vector<256x32xbf16>, vector<64x32xf32> -> vector<64x32xf32>
    %120 = arith.addf %117, %119 : vector<64x32xf32>
    %c0_46 = arith.constant 0 : index
    %c0_47 = arith.constant 0 : index
    %121 = vector.load %arg4[%c0_46, %c0_47] : memref<256x32xbf16, #tpu.memory_space<vmem>>, vector<256x32xbf16>
    %cst_48 = arith.constant dense<0.000000e+00> : vector<64x32xf32>
    %122 = tpu.matmul %115, %121, %cst_48 {dimension_numbers = #tpu.dot_dimension_numbers<[1], [0], [0], [1], [0, 0, 1, 1], [], []>} : vector<64x256xbf16>, vector<256x32xbf16>, vector<64x32xf32> -> vector<64x32xf32>
    %123 = arith.addf %120, %122 : vector<64x32xf32>
    %124 = vector.broadcast %2 : vector<1x32xf32> to vector<64x32xf32>
    %125 = arith.addf %123, %124 : vector<64x32xf32>
    %c0_49 = arith.constant 0 : index
    %c96 = arith.constant 96 : index
    %126 = vector.load %arg6[%c0_49, %c96] : memref<64x128xf32, #tpu.memory_space<vmem>>, vector<64x32xf32>
    tpu.vector_store %arg6[%c0_49, %c96], %125 {strides = array<i32>} : memref<64x128xf32, #tpu.memory_space<vmem>>, vector<64x32xf32>,
    return
  }
  func.func @transform_0(%arg0: i32) -> (i32, i32, i32) {
    %c0_i32 = arith.constant 0 : i32
    %c0_i32_0 = arith.constant 0 : i32
    %c0_i32_1 = arith.constant 0 : i32
    return %c0_i32, %arg0, %c0_i32_0 : i32, i32, i32
  }
  func.func @transform_1(%arg0: i32) -> (i32, i32) {
    %c0_i32 = arith.constant 0 : i32
    %c0_i32_0 = arith.constant 0 : i32
    %c0_i32_1 = arith.constant 0 : i32
    return %c0_i32, %c0_i32_0 : i32, i32
  }
  func.func @transform_2(%arg0: i32) -> (i32, i32) {
    %c0_i32 = arith.constant 0 : i32
    %c0_i32_0 = arith.constant 0 : i32
    %c0_i32_1 = arith.constant 0 : i32
    return %c0_i32, %c0_i32_0 : i32, i32
  }
  func.func @transform_3(%arg0: i32) -> (i32, i32) {
    %c0_i32 = arith.constant 0 : i32
    %c0_i32_0 = arith.constant 0 : i32
    %c0_i32_1 = arith.constant 0 : i32
    return %c0_i32, %c0_i32_0 : i32, i32
  }
  func.func @transform_4(%arg0: i32) -> (i32, i32) {
    %c0_i32 = arith.constant 0 : i32
    %c0_i32_0 = arith.constant 0 : i32
    %c0_i32_1 = arith.constant 0 : i32
    return %c0_i32, %c0_i32_0 : i32, i32
  }
  func.func @transform_5(%arg0: i32) -> (i32, i32) {
    %c0_i32 = arith.constant 0 : i32
    %c0_i32_0 = arith.constant 0 : i32
    return %arg0, %c0_i32 : i32, i32
  }
}

</mosaic_0001>

<bundles_post_ra>
// kernel: tpu_custom_call.1
= control target key start
LH: loop header
LB: loop body
LE: loop exit
PB: predicated region body
PF: predicated region fallthrough
CT: control target
= control target key end

     0   :  { %10 = vsyncpa [#allocation4], 0  ;;  %s5958_s0 = inlined_call_operand.vmem [shape: s32[4,128,3], index: 0, kind: input, shape index: {}]   ;;  %s5959_s1 = inlined_call_operand.vmem [shape: bf16[16,32], index: 1, kind: input, shape index: {}]   ;;  %s5960_s2 = inlined_call_operand.vmem [shape: bf16[256,32], index: 2, kind: input, shape index: {}]   ;;  %s5961_s3 = inlined_call_operand.vmem [shape: bf16[256,32], index: 3, kind: input, shape index: {}]   ;;  %s5962_s4 = inlined_call_operand.vmem [shape: f32[1,32], index: 4, kind: input, shape index: {}]   ;;  %s5963_s5 = inlined_call_operand.hbm [shape: f32[128,128], index: 5, kind: output, shape index: {}]  }
   0x1   :  { %12 = vsyncpa [#allocation4 + $0x1], 0  ;;  %s4620_s18 = smov 0   ;;  %s4622_s19 = smov 0  }
   0x2   :  { %s4624_s20 = smov 0   ;;  %s4626_s21 = smov 0  }
   0x3 LB: > { %s3441_s22 = sadd.s32 4294967295, %s4577_s21   ;;  %s3442_s23 = sadd.s32 4294967294, %s4577_s21   ;;  %s4577_s21 = sphi %s4626_s21, %s5969_s21   ;;  %s4573_s20 = sphi %s4624_s20, %s5968_s20   ;;  %s4569_s19 = sphi %s4622_s19, %s5967_s19   ;;  %s4565_s18 = sphi %s4620_s18, %s5966_s18  }
   0x4   : > { %s4643_s24 = sadd.s32 1, %s4577_s21   ;;  %s25_s25 = sadd.s32 1, %s4573_s20 }
   0x5   : > { %s22_s26 = ssub.s32 %s4577_s21, %s4643_s24  ;;  %p32_p0 = scmp.ne.s32.totalorder %s4573_s20, %s4569_s19 }
   0x6   : > { %p23_p1 = scmp.eq.s32.totalorder %s22_s26, 0  ;;  %p33_p2 = scmp.eq.s32.totalorder %s4577_s21, 0 }
   0x7   : > { %p146_p3 = scmp.eq.s32.totalorder %s3441_s22, 1  ;;  %p151_p4 = scmp.ne.s32.totalorder %s4569_s19, %s4565_s18 }
   0x8   : > { %s4656_s27 = scalar_select %p23_p1, %s4573_s20, %s25_s25  }
   0x9   : > { %p34_p5 = por %p33_p2, %p32_p0  ;;  %p4658_p6 = por %p146_p3, %p32_p0 }
   0xa   : > { %p152_p7 = scmp.eq.s32.totalorder %s3442_s23, 1  ;;  %p3444_p9 = scmp.ge.s32.totalorder %s4577_s21, 2 }
   0xc   : > { %p4662_p8 = por %p152_p7, %p151_p4  ;;  %180 = sbr.rel (%p3444_p9) target bundleno = 37 (0x25), region = 32 }
  0x11   : > { %183 = sbr.rel (!%p34_p5) target bundleno = 37 (0x25), region = 36  ;;  %s185_s30 = sand.u32 (%p34_p5), 1, %s4573_s20  }
  0x12   : > { %s3917_s6 = sshll.u32 (%p34_p5), %s4577_s21, 6  ;;  %s3445_s7 = sshll.u32 (%p34_p5), %s185_s30, 8 }
  0x13   : > { %s4674_s10 = scalar_lea.vmem (%p34_p5), %s5958_s0, %s3917_s6  ;;  %s4679_s11 = scalar_lea.vmem (%p34_p5), [#allocation2], %s3445_s7 }
  0x14   : > { %v281_v0 = vld [vmem:[%s4674_s10] sm:$0xff] (%p34_p5)  ;;  %v283_v1 = vld [vmem:[%s4674_s10 + $0x8] sm:$0xff] (%p34_p5)  ;;  %v285_v2 = vld [vmem:[%s4674_s10 + $0x10] sm:$0xff] (%p34_p5) }
  0x15   : > { %282 = vst [vmem:[%s4679_s11] sm:$0xff] (%p34_p5), %v281_v0  ;;  %284 = vst [vmem:[%s4679_s11 + $0x8] sm:$0xff] (%p34_p5), %v283_v1  ;;  %v287_v3 = vld [vmem:[%s4674_s10 + $0x18] sm:$0xff] (%p34_p5)  ;;  %v289_v4 = vld [vmem:[%s4674_s10 + $0x20] sm:$0xff] (%p34_p5) }
  0x16   : > { %286 = vst [vmem:[%s4679_s11 + $0x10] sm:$0xff] %v285_v2  ;;  %v291_v5 = vld [vmem:[%s4674_s10 + $0x28] sm:$0xff]  ;;  %288 = vst [vmem:[%s4679_s11 + $0x18] sm:$0xff] %v287_v3  ;;  %v293_v6 = vld [vmem:[%s4674_s10 + $0x30] sm:$0xff] }
  0x17   : > { %290 = vst [vmem:[%s4679_s11 + $0x20] sm:$0xff] %v289_v4  ;;  %292 = vst [vmem:[%s4679_s11 + $0x28] sm:$0xff] %v291_v5  ;;  %v295_v7 = vld [vmem:[%s4674_s10 + $0x38] sm:$0xff]  ;;  %v297_v8 = vld [vmem:[%s4674_s10 + $0x80] sm:$0xff] }
  0x18   : > { %294 = vst [vmem:[%s4679_s11 + $0x30] sm:$0xff] %v293_v6  ;;  %296 = vst [vmem:[%s4679_s11 + $0x38] sm:$0xff] %v295_v7  ;;  %v299_v9 = vld [vmem:[%s4674_s10 + $0x88] sm:$0xff]  ;;  %v301_v10 = vld [vmem:[%s4674_s10 + $0x90] sm:$0xff] }
  0x19   : > { %298 = vst [vmem:[%s4679_s11 + $0x40] sm:$0xff] %v297_v8  ;;  %v303_v11 = vld [vmem:[%s4674_s10 + $0x98] sm:$0xff]  ;;  %300 = vst [vmem:[%s4679_s11 + $0x48] sm:$0xff] %v299_v9  ;;  %v305_v12 = vld [vmem:[%s4674_s10 + $0xa0] sm:$0xff] }
  0x1a   : > { %302 = vst [vmem:[%s4679_s11 + $0x50] sm:$0xff] %v301_v10  ;;  %304 = vst [vmem:[%s4679_s11 + $0x58] sm:$0xff] %v303_v11  ;;  %v307_v13 = vld [vmem:[%s4674_s10 + $0xa8] sm:$0xff]  ;;  %v309_v14 = vld [vmem:[%s4674_s10 + $0xb0] sm:$0xff] }
  0x1b   : > { %306 = vst [vmem:[%s4679_s11 + $0x60] sm:$0xff] %v305_v12  ;;  %308 = vst [vmem:[%s4679_s11 + $0x68] sm:$0xff] %v307_v13  ;;  %v311_v15 = vld [vmem:[%s4674_s10 + $0xb8] sm:$0xff]  ;;  %v313_v16 = vld [vmem:[%s4674_s10 + $0x100] sm:$0xff] }
  0x1c   : > { %310 = vst [vmem:[%s4679_s11 + $0x70] sm:$0xff] %v309_v14  ;;  %v315_v17 = vld [vmem:[%s4674_s10 + $0x108] sm:$0xff]  ;;  %312 = vst [vmem:[%s4679_s11 + $0x78] sm:$0xff] %v311_v15  ;;  %v317_v18 = vld [vmem:[%s4674_s10 + $0x110] sm:$0xff] }
  0x1d   : > { %314 = vst [vmem:[%s4679_s11 + $0x80] sm:$0xff] %v313_v16  ;;  %316 = vst [vmem:[%s4679_s11 + $0x88] sm:$0xff] %v315_v17  ;;  %v319_v19 = vld [vmem:[%s4674_s10 + $0x118] sm:$0xff]  ;;  %v321_v20 = vld [vmem:[%s4674_s10 + $0x120] sm:$0xff] }
  0x1e   : > { %318 = vst [vmem:[%s4679_s11 + $0x90] sm:$0xff] %v317_v18  ;;  %320 = vst [vmem:[%s4679_s11 + $0x98] sm:$0xff] %v319_v19  ;;  %v323_v21 = vld [vmem:[%s4674_s10 + $0x128] sm:$0xff]  ;;  %v325_v22 = vld [vmem:[%s4674_s10 + $0x130] sm:$0xff] }
  0x1f   : > { %322 = vst [vmem:[%s4679_s11 + $0xa0] sm:$0xff] %v321_v20  ;;  %v327_v23 = vld [vmem:[%s4674_s10 + $0x138] sm:$0xff]  ;;  %324 = vst [vmem:[%s4679_s11 + $0xa8] sm:$0xff] %v323_v21  ;;  %v329_v24 = vld [vmem:[%s4674_s10 + $0x180] sm:$0xff] }
  0x20   : > { %326 = vst [vmem:[%s4679_s11 + $0xb0] sm:$0xff] %v325_v22  ;;  %328 = vst [vmem:[%s4679_s11 + $0xb8] sm:$0xff] %v327_v23  ;;  %v331_v25 = vld [vmem:[%s4674_s10 + $0x188] sm:$0xff]  ;;  %v333_v26 = vld [vmem:[%s4674_s10 + $0x190] sm:$0xff] }
  0x21   : > { %330 = vst [vmem:[%s4679_s11 + $0xc0] sm:$0xff] %v329_v24  ;;  %332 = vst [vmem:[%s4679_s11 + $0xc8] sm:$0xff] %v331_v25  ;;  %v335_v27 = vld [vmem:[%s4674_s10 + $0x198] sm:$0xff]  ;;  %v337_v28 = vld [vmem:[%s4674_s10 + $0x1a0] sm:$0xff] }
  0x22   : > { %334 = vst [vmem:[%s4679_s11 + $0xd0] sm:$0xff] %v333_v26  ;;  %v339_v29 = vld [vmem:[%s4674_s10 + $0x1a8] sm:$0xff]  ;;  %336 = vst [vmem:[%s4679_s11 + $0xd8] sm:$0xff] %v335_v27  ;;  %v341_v30 = vld [vmem:[%s4674_s10 + $0x1b0] sm:$0xff] }
  0x23   : > { %338 = vst [vmem:[%s4679_s11 + $0xe0] sm:$0xff] %v337_v28  ;;  %340 = vst [vmem:[%s4679_s11 + $0xe8] sm:$0xff] %v339_v29  ;;  %v343_v31 = vld [vmem:[%s4674_s10 + $0x1b8] sm:$0xff] }
  0x24   : > { %342 = vst [vmem:[%s4679_s11 + $0xf0] sm:$0xff] %v341_v30  ;;  %344 = vst [vmem:[%s4679_s11 + $0xf8] sm:$0xff] %v343_v31 }
  0x25 PF: > { %p3448_p10 = scmp.ge.s32.totalorder %s4577_s21, 1  ;;  %p349_p11 = scmp.lt.s32.totalorder %s4577_s21, 3 }
  0x27   : > { %p350_p12 = pnand %p3448_p10, %p349_p11 }
  0x28   : > { %s4745_s12 = sand.u32 (!%p350_p12), 1, %s4569_s19   ;;  %s4584_s6 = smov (!%p350_p12), 32  }
  0x29   : > { %353 = sbr.rel (%p350_p12) target bundleno = 759 (0x2f7), region = 74  ;;  %s3449_s13 = sshll.u32 (!%p350_p12), %s4745_s12, 8 }
  0x2a   : > { %s4756_s23 = scalar_lea.vmem (!%p350_p12), [#allocation2], %s3449_s13  ;;  %s3450_s17 = sshll.u32 (!%p350_p12), %s4745_s12, 6 }
  0x2b   : > { %s5696_s30 = scalar_lea.vmem (!%p350_p12), [#allocation3], %s3450_s17  ;;  %s4585_s7 = smov (!%p350_p12), 64  }
  0x2c   : > { %s4586_s8 = smov (!%p350_p12), 96   ;;  %s3374_s9 = sshll.u32 (!%p350_p12), %s5696_s30, 4  ;;  %s5913_s9 = int_to_ptr.vmem [resolvable:$true] %s3374_s9 }
  0x2d   : > { %s4517_s14 = scalar_lea.vmem (!%p350_p12), %s5913_s9, 1024  ;;  %s4587_s15 = smov (!%p350_p12), [#allocation3]  }
  0x2e   : > { %v4579_v32 = vmov 0   ;;  %v4385_v33 = vld [vmem:[%s5960_s2 + $0x78] sm:$0xff]   ;;  %v4759_v35 = vld [vmem:[%s4756_s23 + $0x10] sm:$0xff]  ;;  %v390_v36 = vld [vmem:[%s4756_s23] sm:$0xff]  ;;  %v4580_v51 = vmov 2   ;;  %v4581_v54 = vmov 1   ;;  %v386_v14 = vlaneseq  ;;  %p4518_p13 = scmp.ne.s32.totalorder %s5913_s9, %s4517_s14 }
  0x2f   : > { %4349 = vset.pattern.permute.xlu1 %v4579_v32  ;;  %4348 = vset.pattern.permute.xlu0 %v4579_v32  ;;  %v4386_v34 = vld [vmem:[%s5960_s2 + $0x38] sm:$0xff]   ;;  %v391_v38 = vld [vmem:[%s4756_s23 + $0x8] sm:$0xff]  ;;  %v4772_v40 = vld [vmem:[%s4756_s23 + $0x20] sm:$0xff]  ;;  %v4582_v21 = vmov 0.0   ;;  %vm811_vm4 = vcmask 130048   ;;  %s4521_s16 = sshll.u32 %s4587_s15, 4  ;;  %s4522_s16 = int_to_ptr.vmem [resolvable:$false] %s4521_s16 }
  0x30   : > { %3919 = vmatprep.subr.bf16.mxu0 %v4385_v33  ;;  %405 = vperm.xlu1 %4349, %v4759_v35   ;;  %v4764_v37 = vld [vmem:[%s4756_s23 + $0x18] sm:$0xff]  ;;  %v4769_v39 = vld [vmem:[%s4756_s23 + $0x28] sm:$0xff]  ;;  %v4387_v41 = vld [vmem:[%s5960_s2 + $0x70] sm:$0xff]   ;;  %v4908_v16 = vand.u32 127, %v386_v14  ;;  %p4519_p0 = pnand %p4518_p13, %p4658_p6  ;;  %s4523_s17 = scalar_lea.vmem %s4522_s16, 2048 }
  0x31   : > { %399 = vperm.xlu0 %4348, %v390_v36   ;;  %3920 = vmatpush3.bf16.msra.mxu0 %v4386_v34  ;;  %v4778_v42 = vld [vmem:[%s4756_s23 + $0x38] sm:$0xff]  ;;  %v4388_v43 = vld [vmem:[%s5960_s2 + $0x30] sm:$0xff]   ;;  %v4389_v45 = vld [vmem:[%s5959_s1] sm:$0xff]   ;;  %p4524_p2 = scmp.lt.s32.totalorder %s5913_s9, %s4522_s16  ;;  %p4525_p3 = scmp.lt.s32.totalorder %s4523_s17, %s4517_s14 }
  0x32   : > { %v396_v44 = vld [vmem:[%s4756_s23 + $0x30] sm:$0xff]  ;;  %3921 = vmatprep.subr.bf16.mxu0 %v4387_v41  ;;  %v4390_v46 = vld [vmem:[%s5960_s2 + $0x68] sm:$0xff]   ;;  %4259 = vmatprep.subr.bf16.mxu1 %v4389_v45  ;;  %v4392_v48 = vld [vmem:[%s5961_s3 + $0x78] sm:$0xff]   ;;  %p4520_p1 = pneg %p4519_p0 }
  0x33   : > { %v4391_v47 = vld [vmem:[%s5960_s2 + $0x28] sm:$0xff]   ;;  %4260 = vmatpush3.bf16.msra.mxu1 %v4389_v45  ;;  %v4393_v49 = vld [vmem:[%s5960_s2 + $0x60] sm:$0xff]   ;;  %v4397_v52 = vld [vmem:[%s5960_s2 + $0x58] sm:$0xff]   ;;  %p4526_p4 = por %p4525_p3, %p4524_p2 }
  0x34   : > { %408 = vperm.xlu1 %4349, %v4764_v37   ;;  %3964 = vmatprep.subr.bf16.mxu1 %v4392_v48  ;;  %v4395_v50 = vld [vmem:[%s5960_s2 + $0x20] sm:$0xff]   ;;  %v4399_v53 = vld [vmem:[%s5960_s2 + $0x18] sm:$0xff]   ;;  %v4401_v55 = vld [vmem:[%s5960_s2 + $0x50] sm:$0xff]  }
  0x35   : > { %402 = vperm.xlu0 %4348, %v391_v38   ;;  %3922 = vmatpush3.bf16.msra.mxu0 %v4388_v43  ;;  %v4403_v56 = vld [vmem:[%s5960_s2 + $0x10] sm:$0xff]   ;;  %v4405_v57 = vld [vmem:[%s5960_s2 + $0x48] sm:$0xff]   ;;  %v4409_v59 = vld [vmem:[%s5960_s2 + $0x40] sm:$0xff]   ;;  %v4952_v43 = vadd.s32 128, %v4908_v16  ;;  %p4527_p5 = pnand %p4526_p4, %p4520_p1 }
  0x36   : > { %3923 = vmatprep.subr.bf16.mxu0 %v4390_v46  ;;  %v4407_v58 = vld [vmem:[%s5960_s2 + $0x8] sm:$0xff]   ;;  %v3561_v60 = vld [vmem:[%s4756_s23 + $0x40] sm:$0xff]  ;;  %v4422_v62 = vld [vmem:[%s5961_s3 + $0x78] sm:$0xff]  }
  0x37   : > { %v4411_v61 = vld [vmem:[%s5960_s2] sm:$0xff]   ;;  %v3563_v63 = vld [vmem:[%s4756_s23 + $0x50] sm:$0xff]  ;;  %v3562_v1 = vld [vmem:[%s4756_s23 + $0x48] sm:$0xff] }
  0x38   : > { %414 = vperm.xlu1 %4349, %v4769_v39   ;;  %v3565_v0 = vld [vmem:[%s4756_s23 + $0x60] sm:$0xff]  ;;  %v3568_v2 = vld [vmem:[%s4756_s23 + $0x78] sm:$0xff]  ;;  %v3566_v4 = vld [vmem:[%s4756_s23 + $0x68] sm:$0xff] }
  0x39   : > { %411 = vperm.xlu0 %4348, %v4772_v40   ;;  %3924 = vmatpush3.bf16.msra.mxu0 %v4391_v47  ;;  %v3564_v3 = vld [vmem:[%s4756_s23 + $0x58] sm:$0xff]  ;;  %v4863_v5 = vld [vmem:[%s4756_s23 + $0x80] sm:$0xff]  ;;  %v3567_v6 = vld [vmem:[%s4756_s23 + $0x70] sm:$0xff] }
  0x3a   : > { %3925 = vmatprep.subr.bf16.mxu0 %v4393_v49  ;;  %v4868_v7 = vld [vmem:[%s4756_s23 + $0x98] sm:$0xff]  ;;  %v4875_v8 = vld [vmem:[%s4756_s23 + $0xb0] sm:$0xff]  ;;  %v4880_v9 = vld [vmem:[%s4756_s23 + $0x88] sm:$0xff] }
  0x3b   : > { %v4886_v10 = vld [vmem:[%s4756_s23 + $0xc0] sm:$0xff]  ;;  %v4892_v11 = vld [vmem:[%s4756_s23 + $0xd0] sm:$0xff]  ;;  %v4901_v13 = vld [vmem:[%s4756_s23 + $0xe8] sm:$0xff] }
  0x3c   : > { %420 = vperm.xlu1 %4349, %v4778_v42   ;;  %v4898_v12 = vld [vmem:[%s4756_s23 + $0x90] sm:$0xff]  ;;  %v4394_v28 = vld [vmem:[%s5961_s3 + $0x38] sm:$0xff]   ;;  %v4402_v45 = vld [vmem:[%s5961_s3 + $0x28] sm:$0xff]  }
  0x3d   : > { %417 = vperm.xlu0 %4348, %v396_v44   ;;  %3926 = vmatpush3.bf16.msra.mxu0 %v4395_v50  ;;  %v4906_v15 = vld [vmem:[%s4756_s23 + $0xf0] sm:$0xff]  ;;  %v4959_v46 = vld [vmem:[%s4756_s23 + $0xc8] sm:$0xff]  ;;  %v4404_v48 = vld [vmem:[%s5961_s3 + $0x60] sm:$0xff]  }
  0x3e   : > { %3927 = vmatprep.subr.bf16.mxu0 %v4397_v52  ;;  %v4396_v31 = vld [vmem:[%s5961_s3 + $0x70] sm:$0xff]   ;;  %v4962_v47 = vld [vmem:[%s4756_s23 + $0xa8] sm:$0xff]  ;;  %v4406_v52 = vld [vmem:[%s5961_s3 + $0x20] sm:$0xff]  }
  0x3f   : > { %v4415_v14 = vld [vmem:[%s5961_s3 + $0x8] sm:$0xff]  }
  0x40   : > { %4351 = vset.pattern.permute.xlu1 %v4580_v51 }
  0x41   : > { %4350 = vset.pattern.permute.xlu0 %v4580_v51  ;;  %534 = vperm.xlu1 %4351, %v391_v38  }
  0x42   : > { %531 = vperm.xlu0 %4350, %v390_v36   ;;  %3928 = vmatpush3.bf16.msra.mxu0 %v4399_v53  ;;  %v4583_v53 = vmov 1.0|1.0  }
  0x43   : > { %3929 = vmatprep.subr.bf16.mxu0 %v4401_v55  ;;  %v4983_v55 = vld [vmem:[%s4756_s23 + $0xb8] sm:$0xff] }
  0x45   : > { %537 = vperm.xlu1 %4351, %v4759_v35  }
  0x46   : > { %4353 = vset.pattern.permute.xlu0 %v4581_v54  ;;  %3930 = vmatpush3.bf16.msra.mxu0 %v4403_v56  ;;  %v4408_v56 = vld [vmem:[%s5961_s3 + $0x58] sm:$0xff]  }
  0x47   : > { %454 = vperm.xlu0 %4353, %v391_v38   ;;  %3931 = vmatprep.subr.bf16.mxu0 %v4405_v57 }
  0x49   : > { %4352 = vset.pattern.permute.xlu1 %v4581_v54 }
  0x4a   : > { %451 = vperm.xlu1 %4352, %v390_v36   ;;  %3932 = vmatpush3.bf16.msra.mxu0 %v4407_v58 }
  0x4b   : > { %4354 = vset.pattern.permute.xlu0 %v4580_v51  ;;  %3933 = vmatprep.subr.bf16.mxu0 %v4409_v59  ;;  %v4410_v59 = vld [vmem:[%s5961_s3 + $0x18] sm:$0xff]  }
  0x4c   : > { %540 = vperm.xlu0 %4354, %v4764_v37  }
  0x4e   : > { %4355 = vset.pattern.permute.xlu1 %v4580_v51  ;;  %3934 = vmatpush3.bf16.msra.mxu0 %v4411_v61  ;;  %v4999_v61 = vld [vmem:[%s4756_s23 + $0xd8] sm:$0xff] }
  0x4f   : > { %543 = vperm.xlu1 %4355, %v4772_v40   ;;  %4049 = vmatprep.subr.bf16.mxu0 %v4422_v62 }
  0x50   : > { %549 = vperm.xlu0 %4354, %v396_v44  }
  0x53   : > { %546 = vperm.xlu1 %4355, %v4769_v39  }
  0x54   : > { %1255 = vperm.xlu0 %4354, %v3561_v60  }
  0x57   : > { %4356 = vset.pattern.permute.xlu1 %v4581_v54 }
  0x58   : > { %4359 = vset.pattern.permute.xlu0 %v4581_v54  ;;  %460 = vperm.xlu1 %4356, %v4764_v37   ;;  %v4398_v37 = vld [vmem:[%s5961_s3 + $0x30] sm:$0xff]  }
  0x59   : > { %457 = vperm.xlu0 %4359, %v4759_v35   ;;  %v4936_v35 = vld [vmem:[%s4756_s23 + $0xa0] sm:$0xff] }
  0x5c   : > { %4357 = vset.pattern.permute.xlu1 %v4580_v51 }
  0x5d   : > { %466 = vperm.xlu0 %4359, %v4769_v39   ;;  %552 = vperm.xlu1 %4357, %v4778_v42  }
  0x61   : > { %469 = vperm.xlu0 %4359, %v396_v44   ;;  %4358 = vset.pattern.permute.xlu1 %v4581_v54 }
  0x62   : > { %463 = vperm.xlu1 %4358, %v4772_v40   ;;  %v4400_v40 = vld [vmem:[%s5961_s3 + $0x68] sm:$0xff]  }
  0x65   : > { %1181 = vperm.xlu0 %4359, %v3563_v63  }
  0x66   : > { %1175 = vperm.xlu1 %4358, %v3561_v60  }
  0x69   : > { %1187 = vperm.xlu0 %4359, %v3565_v0  }
  0x6a   : > { %1178 = vperm.xlu1 %4358, %v3562_v1  }
  0x6d   : > { %1196 = vperm.xlu0 %4359, %v3568_v2  }
  0x6e   : > { %472 = vperm.xlu1 %4358, %v4778_v42  }
  0x71   : > { %4363 = vset.pattern.permute.xlu0 %v4579_v32 }
  0x72   : > { %1123 = vperm.xlu0 %4363, %v3561_v60   ;;  %1184 = vperm.xlu1 %4358, %v3564_v3   ;;  %v4412_v60 = vld [vmem:[%s5961_s3 + $0x50] sm:$0xff]  }
  0x76   : > { %1132 = vperm.xlu0 %4363, %v3564_v3   ;;  %1190 = vperm.xlu1 %4358, %v3566_v4  }
  0x7a   : > { %4366 = vset.pattern.permute.xlu0 %v4580_v51  ;;  %4360 = vset.pattern.permute.xlu1 %v4580_v51 }
  0x7b   : > { %1270 = vperm.xlu0 %4366, %v3566_v4   ;;  %1258 = vperm.xlu1 %4360, %v3562_v1  }
  0x7f   : > { %4367 = vset.pattern.permute.xlu0 %v4579_v32  ;;  %4361 = vset.pattern.permute.xlu1 %v4581_v54 }
  0x80   : > { %1872 = vperm.xlu0 %4367, %v4863_v5   ;;  %1193 = vperm.xlu1 %4361, %v3567_v6  }
  0x84   : > { %1881 = vperm.xlu0 %4367, %v4868_v7   ;;  %4362 = vset.pattern.permute.xlu1 %v4580_v51 }
  0x85   : > { %1261 = vperm.xlu1 %4362, %v3563_v63  }
  0x88   : > { %1138 = vperm.xlu0 %4367, %v3566_v4   ;;  %v4426_v4 = vld [vmem:[%s5961_s3 + $0x70] sm:$0xff]  }
  0x89   : > { %1264 = vperm.xlu1 %4362, %v3564_v3   ;;  %v4423_v3 = vld [vmem:[%s5961_s3 + $0x38] sm:$0xff]  }
  0x8c   : > { %1144 = vperm.xlu0 %4367, %v3568_v2  }
  0x8d   : > { %4364 = vset.pattern.permute.xlu1 %v4579_v32 }
  0x8e   : > { %1126 = vperm.xlu1 %4364, %v3562_v1   ;;  %v5014_v1 = vld [vmem:[%s4756_s23 + $0xe0] sm:$0xff] }
  0x90   : > { %1890 = vperm.xlu0 %4367, %v4875_v8  }
  0x92   : > { %1129 = vperm.xlu1 %4364, %v3563_v63  }
  0x94   : > { %4371 = vset.pattern.permute.xlu0 %v4581_v54 }
  0x95   : > { %1927 = vperm.xlu0 %4371, %v4880_v9  }
  0x96   : > { %4365 = vset.pattern.permute.xlu1 %v4580_v51 }
  0x97   : > { %1267 = vperm.xlu1 %4365, %v3565_v0  }
  0x99   : > { %1933 = vperm.xlu0 %4371, %v4868_v7  }
  0x9b   : > { %1273 = vperm.xlu1 %4365, %v3567_v6  }
  0x9d   : > { %2673 = vperm.xlu0 %4371, %v4886_v10  }
  0x9f   : > { %1276 = vperm.xlu1 %4365, %v3568_v2   ;;  %v4414_v2 = vld [vmem:[%s5961_s3 + $0x48] sm:$0xff]  }
  0xa1   : > { %1942 = vperm.xlu0 %4371, %v4875_v8  }
  0xa3   : > { %4368 = vset.pattern.permute.xlu1 %v4579_v32 }
  0xa4   : > { %1875 = vperm.xlu1 %4368, %v4880_v9  }
  0xa5   : > { %2679 = vperm.xlu0 %4371, %v4892_v11  }
  0xa8   : > { %1878 = vperm.xlu1 %4368, %v4898_v12  }
  0xa9   : > { %2688 = vperm.xlu0 %4371, %v4901_v13  }
  0xab   : > { %v406_v17 = vpop.permute.xlu1 %405 }
  0xac   : > { %v400_v18 = vpop.permute.xlu0 %399  ;;  %1135 = vperm.xlu1 %4368, %v3565_v0   ;;  %vm424_vm1 = vcmp.eq.s32.totalorder %v4908_v16, %v406_v17  ;;  %v4413_v0 = vld [vmem:[%s5961_s3 + $0x10] sm:$0xff]   ;;  %v4416_v17 = vld [vmem:[%s5961_s3 + $0x40] sm:$0xff]  }
  0xad   : > { %vm422_vm0 = vcmp.eq.s32.totalorder %v4908_v16, %v400_v18  ;;  %2691 = vperm.xlu0 %4371, %v4906_v15   ;;  %v3453_v23 = vsel %vm424_vm1, 1.0, %v4582_v21  ;;  %v4427_v18 = vld [vmem:[%s5961_s3 + $0x30] sm:$0xff]  }
  0xae   : > { %v3451_v22 = vsel %vm422_vm0, 1.0, %v4582_v21 }
  0xaf   : > { %v409_v19 = vpop.permute.xlu1 %408 }
  0xb0   : > { %v403_v20 = vpop.permute.xlu0 %402  ;;  %vm425_vm2 = vcmp.eq.s32.totalorder %v4908_v16, %v409_v19  ;;  %1141 = vperm.xlu1 %4368, %v3567_v6   ;;  %v4430_v19 = vld [vmem:[%s5961_s3 + $0x68] sm:$0xff]  }
  0xb1   : > { %vm423_vm3 = vcmp.eq.s32.totalorder %v4908_v16, %v403_v20  ;;  %4376 = vset.pattern.permute.xlu0 %v4580_v51  ;;  %v3454_v24 = vsel %vm425_vm2, 1.0, %v4582_v21 }
  0xb2   : > { %v3452_v25 = vsel %vm423_vm3, 1.0, %v4582_v21  ;;  %2004 = vperm.xlu0 %4376, %v4863_v5   ;;  %v447_v26 = vpack.c.bf16 %v3454_v24, %v3453_v23  ;;  %v4417_v23 = vld [vmem:[%s5961_s3] sm:$0xff]   ;;  %v4418_v24 = vld [vmem:[%s5960_s2 + $0x78] sm:$0xff]  }
  0xb3   : > { %v446_v27 = vpack.c.bf16 %v3452_v25, %v3451_v22  ;;  %v415_v29 = vpop.permute.xlu1 %414  ;;  %v4431_v25 = vld [vmem:[%s5961_s3 + $0x28] sm:$0xff]  }
  0xb4   : > { %v412_v30 = vpop.permute.xlu0 %411  ;;  %vm427_vm5 = vcmp.eq.s32.totalorder %v4908_v16, %v415_v29  ;;  %4369 = vset.pattern.permute.xlu1 %v4581_v54 }
  0xb5   : > { %vm426_vm6 = vcmp.eq.s32.totalorder %v4908_v16, %v412_v30  ;;  %4261 = vmatprep.mubr.msk.bf16.mxu1 %vm811_vm4, %v446_v27  ;;  %v3456_v33 = vsel %vm427_vm5, 1.0, %v4582_v21  ;;  %1924 = vperm.xlu1 %4369, %v4863_v5   ;;  %v4419_v27 = vld [vmem:[%s5960_s2 + $0x38] sm:$0xff]   ;;  %v4420_v30 = vld [vmem:[%s5960_s2 + $0x70] sm:$0xff]  }
  0xb6   : > { %v3455_v34 = vsel %vm426_vm6, 1.0, %v4582_v21  ;;  %4262 = vmatmul.mubr.msk.bf16.vlgmr.msra.gmra.mxu1 %vm811_vm4, %v447_v26  ;;  %2016 = vperm.xlu0 %4376, %v4936_v35   ;;  %v4434_v26 = vld [vmem:[%s5961_s3 + $0x60] sm:$0xff]  }
  0xb7   : > { %v448_v36 = vpack.c.bf16 %v3456_v33, %v3455_v34  ;;  %3965 = vmatpush3.bf16.msra.mxu1 %v4394_v28  ;;  %v421_v38 = vpop.permute.xlu1 %420  ;;  %v4421_v33 = vld [vmem:[%s5960_s2 + $0x30] sm:$0xff]   ;;  %v4438_v34 = vld [vmem:[%s5961_s3 + $0x58] sm:$0xff]  }
  0xb8   : > { %v418_v39 = vpop.permute.xlu0 %417  ;;  %3966 = vmatprep.subr.bf16.mxu1 %v4396_v31  ;;  %vm429_vm7 = vcmp.eq.s32.totalorder %v4908_v16, %v421_v38  ;;  %v4435_v31 = vld [vmem:[%s5961_s3 + $0x20] sm:$0xff]   ;;  %v4439_v38 = vld [vmem:[%s5961_s3 + $0x18] sm:$0xff]  }
  0xb9   : > { %vm428_vm8 = vcmp.eq.s32.totalorder %v4908_v16, %v418_v39  ;;  %4265 = vmatprep.mubr.msk.bf16.mxu1 %vm811_vm4, %v448_v36  ;;  %v3458_v41 = vsel %vm429_vm7, 1.0, %v4582_v21  ;;  %4370 = vset.pattern.permute.xlu1 %v4579_v32  ;;  %v4425_v39 = vld [vmem:[%s5960_s2 + $0x28] sm:$0xff]  }
  0xba   : > { %v3457_v42 = vsel %vm428_vm8, 1.0, %v4582_v21  ;;  %1884 = vperm.xlu1 %4370, %v4936_v35   ;;  %2756 = vperm.xlu0 %4376, %v4959_v46  }
  0xbb   : > { %v449_v44 = vpack.c.bf16 %v3458_v41, %v3457_v42  ;;  %3967 = vmatpush3.bf16.msra.mxu1 %v4398_v37  ;;  %v4442_v42 = vld [vmem:[%s5961_s3 + $0x50] sm:$0xff]  }
  0xbc   : > { %3968 = vmatprep.subr.bf16.mxu1 %v4400_v40  ;;  %v4968_v49 = vpop.permute.xlu1 %534  ;;  %v4428_v40 = vld [vmem:[%s5960_s2 + $0x60] sm:$0xff]  }
  0xbd   : > { %v4970_v50 = vpop.permute.xlu0 %531  ;;  %vm557_vm9 = vcmp.eq.s32.totalorder %v4952_v43, %v4968_v49  ;;  %vm556_vm2 = vcmp.eq.s32.totalorder %v4908_v16, %v4968_v49 }
  0xbe   : > { %vm555_vm10 = vcmp.eq.s32.totalorder %v4952_v43, %v4970_v50  ;;  %4266 = vmatmul.mubr.msk.bf16.gmra.mxu1 %vm811_vm4, %v449_v44  ;;  %1887 = vperm.xlu1 %4370, %v4962_v47   ;;  %vm554_vm3 = vcmp.eq.s32.totalorder %v4908_v16, %v4970_v50  ;;  %v4429_v44 = vld [vmem:[%s5960_s2 + $0x20] sm:$0xff]   ;;  %v4436_v50 = vld [vmem:[%s5960_s2 + $0x50] sm:$0xff]  }
  0xbf   : > { %vm3544_vm11 = vmpackc.low %vm557_vm9, %vm555_vm10  ;;  %3969 = vmatpush3.bf16.msra.mxu1 %v4402_v45  ;;  %2025 = vperm.xlu0 %4376, %v4983_v55   ;;  %v4443_v45 = vld [vmem:[%s5961_s3 + $0x10] sm:$0xff]  }
  0xc0   : > { %3545 = vmatprep.mubr.msk.bf16.mxu1 %vm3544_vm11, %v4583_v53  ;;  %3970 = vmatprep.subr.bf16.mxu1 %v4404_v48  ;;  %v4988_v57 = vpop.permute.xlu1 %537  ;;  %vm3546_vm6 = vmpackc.low %vm556_vm2, %vm554_vm3  ;;  %v4446_v48 = vld [vmem:[%s5961_s3 + $0x48] sm:$0xff]  }
  0xc1   : > { %vm559_vm7 = vcmp.eq.s32.totalorder %v4952_v43, %v4988_v57 }
  0xc2   : > { %v455_v58 = vpop.permute.xlu0 %454  ;;  %1893 = vperm.xlu1 %4370, %v4983_v55  }
  0xc3   : > { %3971 = vmatpush3.bf16.msra.mxu1 %v4406_v52  ;;  %vm477_vm12 = vcmp.eq.s32.totalorder %v4952_v43, %v455_v58  ;;  %2762 = vperm.xlu0 %4376, %v4999_v61   ;;  %vm476_vm14 = vcmp.eq.s32.totalorder %v4908_v16, %v455_v58  ;;  %v4447_v52 = vld [vmem:[%s5961_s3 + $0x8] sm:$0xff]   ;;  %v4437_v58 = vld [vmem:[%s5960_s2 + $0x10] sm:$0xff]  }
  0xc4   : > { %3972 = vmatprep.subr.bf16.mxu1 %v4408_v56 }
  0xc5   : > { %v452_v62 = vpop.permute.xlu1 %451 }
  0xc6   : > { %4372 = vset.pattern.permute.xlu1 %v4581_v54  ;;  %vm475_vm13 = vcmp.eq.s32.totalorder %v4952_v43, %v452_v62  ;;  %vm474_vm15 = vcmp.eq.s32.totalorder %v4908_v16, %v452_v62  ;;  %v5200_v62 = vld [vmem:[%s5959_s1] sm:$0xff]  }
  0xc7   : > { %3973 = vmatpush3.bf16.msra.mxu1 %v4410_v59  ;;  %v5004_v63 = vpop.permute.xlu0 %540  ;;  %1930 = vperm.xlu1 %4372, %v4898_v12   ;;  %vm3507_vm0 = vmpackc.low %vm477_vm12, %vm475_vm13  ;;  %v4440_v59 = vld [vmem:[%s5960_s2 + $0x48] sm:$0xff]  }
  0xc8   : > { %3974 = vmatprep.subr.bf16.mxu1 %v4412_v60  ;;  %3508 = vmatprep.mubr.msk.bf16.mxu0 %vm3507_vm0, %v4583_v53  ;;  %vm3509_vm1 = vmpackc.low %vm476_vm14, %vm474_vm15  ;;  %vm561_vm5 = vcmp.eq.s32.totalorder %v4952_v43, %v5004_v63  ;;  %vm560_vm15 = vcmp.eq.s32.totalorder %v4908_v16, %v5004_v63  ;;  %v4449_v60 = vld [vmem:[%s5961_s3] sm:$0xff]  }
  0xc9   : > { %2765 = vperm.xlu0 %4376, %v5014_v1   ;;  %3510 = vmatmul.mubr.msk.bf16.vlgmr.msra.gmra.mxu0 %vm3509_vm1, %v4583_v53  ;;  %vm3548_vm8 = vmpackc.low %vm561_vm5, %vm559_vm7  ;;  %vm558_vm1 = vcmp.eq.s32.totalorder %v4908_v16, %v4988_v57 }
  0xca   : > { %v5027_v5 = vpop.permute.xlu1 %543  ;;  %4050 = vmatpush3.bf16.msra.mxu0 %v4423_v3  ;;  %vm3550_vm2 = vmpackc.low %vm560_vm15, %vm558_vm1  ;;  %v4445_v3 = vld [vmem:[%s5960_s2] sm:$0xff]  }
  0xcb   : > { %3975 = vmatpush3.bf16.msra.mxu1 %v4413_v0  ;;  %v5029_v6 = vpop.permute.xlu0 %549  ;;  %1936 = vperm.xlu1 %4372, %v4936_v35   ;;  %v4424_v35 = vld [vmem:[%s5960_s2 + $0x68] sm:$0xff]   ;;  %vm563_vm3 = vcmp.eq.s32.totalorder %v4952_v43, %v5027_v5  ;;  %vm562_vm15 = vcmp.eq.s32.totalorder %v4908_v16, %v5027_v5  ;;  %v4450_v5 = vld [vmem:[%s5959_s1] sm:$0xff]  }
  0xcc   : > { %3976 = vmatprep.subr.bf16.mxu1 %v4414_v2  ;;  %4051 = vmatprep.subr.bf16.mxu0 %v4426_v4  ;;  %v4441_v0 = vld [vmem:[%s5960_s2 + $0x8] sm:$0xff]   ;;  %v4444_v2 = vld [vmem:[%s5960_s2 + $0x40] sm:$0xff]  }
  0xcd   : > { %4380 = vset.pattern.permute.xlu0 %v4579_v32 }
  0xce   : > { %v5046_v20 = vpop.permute.xlu1 %546  ;;  %2624 = vperm.xlu0 %4380, %v4959_v46   ;;  %4052 = vmatpush3.bf16.msra.mxu0 %v4427_v18 }
  0xcf   : > { %3977 = vmatpush3.bf16.msra.mxu1 %v4415_v14  ;;  %v5048_v22 = vpop.permute.xlu0 %1255  ;;  %1939 = vperm.xlu1 %4372, %v4962_v47   ;;  %vm565_vm0 = vcmp.eq.s32.totalorder %v4952_v43, %v5046_v20  ;;  %v5238_v14 = vld [vmem:[%s4756_s23 + $0xf8] sm:$0xff]  ;;  %s3918_s23 = sshll.u32 %s3441_s22, 10  ;;  %s3361_s22 = scalar_lea.sflag [#allocation4], %s4745_s12 }
  0xd0   : > { %3978 = vmatprep.subr.bf16.mxu1 %v4416_v17  ;;  %4053 = vmatprep.subr.bf16.mxu0 %v4430_v19  ;;  %v4466_v19 = vld [vmem:[%s5960_s2 + $0x78] sm:$0xff]   ;;  %s5911_s13 = scalar_lea.hbm %s5963_s5, %s3918_s23 }
  0xd2   : > { %2636 = vperm.xlu0 %4380, %v4901_v13   ;;  %4054 = vmatpush3.bf16.msra.mxu0 %v4431_v25 }
  0xd3   : > { %3979 = vmatpush3.bf16.msra.mxu1 %v4417_v23  ;;  %2676 = vperm.xlu1 %4372, %v4959_v46   ;;  %v461_v28 = vpop.permute.xlu1 %460  ;;  %v4432_v46 = vld [vmem:[%s5960_s2 + $0x58] sm:$0xff]  }
  0xd4   : > { %v458_v29 = vpop.permute.xlu0 %457  ;;  %4004 = vmatprep.subr.bf16.mxu1 %v4418_v24  ;;  %vm480_vm9 = vcmp.eq.s32.totalorder %v4908_v16, %v461_v28  ;;  %vm481_vm10 = vcmp.eq.s32.totalorder %v4952_v43, %v461_v28  ;;  %4055 = vmatprep.subr.bf16.mxu0 %v4434_v26 }
  0xd5   : > { %vm478_vm11 = vcmp.eq.s32.totalorder %v4908_v16, %v458_v29  ;;  %vm479_vm12 = vcmp.eq.s32.totalorder %v4952_v43, %v458_v29 }
  0xd6   : > { %vm3511_vm13 = vmpackc.low %vm481_vm10, %vm479_vm12  ;;  %3547 = vmatmul.mubr.msk.bf16.vlgmr.msra.gmra.mxu1 %vm3546_vm6, %v4583_v53  ;;  %4056 = vmatpush3.bf16.msra.mxu0 %v4435_v31  ;;  %vm564_vm12 = vcmp.eq.s32.totalorder %v4908_v16, %v5046_v20 }
  0xd7   : > { %vm3513_vm14 = vmpackc.low %vm480_vm9, %vm478_vm11  ;;  %3549 = vmatprep.mubr.msk.bf16.mxu1 %vm3548_vm8, %v4583_v53  ;;  %4005 = vmatpush3.bf16.msra.mxu1 %v4419_v27 }
  0xd8   : > { %3512 = vmatprep.mubr.msk.bf16.mxu0 %vm3511_vm13, %v4583_v53  ;;  %1945 = vperm.xlu1 %4372, %v4983_v55   ;;  %v5101_v36 = vpop.permute.xlu1 %552  ;;  %v467_v37 = vpop.permute.xlu0 %466  ;;  %vm3552_vm6 = vmpackc.low %vm565_vm0, %vm563_vm3  ;;  %vm567_vm13 = vcmp.eq.s32.totalorder %v4952_v43, %v5029_v6  ;;  %v4448_v55 = vld [vmem:[%s5961_s3 + $0x40] sm:$0xff]  }
  0xd9   : > { %3514 = vmatmul.mubr.msk.bf16.gmra.mxu0 %vm3513_vm14, %v4583_v53  ;;  %4006 = vmatprep.subr.bf16.mxu1 %v4420_v30  ;;  %vm485_vm5 = vcmp.eq.s32.totalorder %v4952_v43, %v467_v37  ;;  %vm484_vm7 = vcmp.eq.s32.totalorder %v4908_v16, %v467_v37  ;;  %vm569_vm14 = vcmp.eq.s32.totalorder %v4952_v43, %v5101_v36  ;;  %vm3554_vm0 = vmpackc.low %vm564_vm12, %vm562_vm15  ;;  %v4454_v37 = vld [vmem:[%s5960_s2 + $0x30] sm:$0xff]  }
  0xda   : > { %4383 = vset.pattern.permute.xlu0 %v4580_v51  ;;  %4057 = vmatprep.subr.bf16.mxu0 %v4438_v34  ;;  %vm3556_vm1 = vmpackc.low %vm569_vm14, %vm567_vm13  ;;  %vm568_vm3 = vcmp.eq.s32.totalorder %v4908_v16, %v5101_v36 }
  0xdb   : > { %4007 = vmatpush3.bf16.msra.mxu1 %v4421_v33  ;;  %2771 = vperm.xlu0 %4383, %v4906_v15  }
  0xdc   : > { %2682 = vperm.xlu1 %4372, %v4999_v61   ;;  %4008 = vmatprep.subr.bf16.mxu1 %v4424_v35  ;;  %v470_v57 = vpop.permute.xlu0 %469  ;;  %v4453_v35 = vld [vmem:[%s5960_s2 + $0x70] sm:$0xff]  }
  0xdd   : > { %v464_v41 = vpop.permute.xlu1 %463  ;;  %4058 = vmatpush3.bf16.msra.mxu0 %v4439_v38  ;;  %v4455_v38 = vld [vmem:[%s5960_s2 + $0x68] sm:$0xff]  }
  0xde   : > { %3551 = vmatmul.mubr.msk.bf16.gmra.mxu1 %vm3550_vm2, %v4583_v53  ;;  %vm482_vm8 = vcmp.eq.s32.totalorder %v4908_v16, %v464_v41  ;;  %vm483_vm9 = vcmp.eq.s32.totalorder %v4952_v43, %v464_v41  ;;  %4059 = vmatprep.subr.bf16.mxu0 %v4442_v42  ;;  %vm566_vm2 = vcmp.eq.s32.totalorder %v4908_v16, %v5029_v6 }
  0xdf   : > { %3553 = vmatprep.mubr.msk.bf16.mxu1 %vm3552_vm6, %v4583_v53  ;;  %4009 = vmatpush3.bf16.msra.mxu1 %v4425_v39  ;;  %vm3515_vm10 = vmpackc.low %vm485_vm5, %vm483_vm9  ;;  %vm487_vm5 = vcmp.eq.s32.totalorder %v4952_v43, %v470_v57  ;;  %vm486_vm6 = vcmp.eq.s32.totalorder %v4908_v16, %v470_v57  ;;  %v4467_v57 = vld [vmem:[%s5960_s2 + $0x38] sm:$0xff]  }
  0xe0   : > { %4373 = vset.pattern.permute.xlu1 %v4580_v51  ;;  %4010 = vmatprep.subr.bf16.mxu1 %v4428_v40  ;;  %vm3517_vm11 = vmpackc.low %vm484_vm7, %vm482_vm8  ;;  %v1182_v4 = vpop.permute.xlu0 %1181 }
  0xe1   : > { %2007 = vperm.xlu1 %4373, %v4880_v9   ;;  %3516 = vmatprep.mubr.msk.bf16.mxu0 %vm3515_vm10, %v4583_v53  ;;  %v5149_v49 = vpop.permute.xlu1 %1175  ;;  %v4433_v9 = vld [vmem:[%s5960_s2 + $0x18] sm:$0xff]   ;;  %vm3558_vm10 = vmpackc.low %vm568_vm3, %vm566_vm2 }
  0xe2   : > { %3518 = vmatmul.mubr.msk.bf16.gmra.mxu0 %vm3517_vm11, %v4583_v53  ;;  %vm1199_vm12 = vcmp.eq.s32.totalorder %v4952_v43, %v5149_v49  ;;  %vm1198_vm2 = vcmp.eq.s32.totalorder %v4908_v16, %v5149_v49 }
  0xe3   : > { %4011 = vmatpush3.bf16.msra.mxu1 %v4429_v44  ;;  %4060 = vmatpush3.bf16.msra.mxu0 %v4443_v45 }
  0xe4   : > { %4012 = vmatprep.subr.bf16.mxu1 %v4432_v46  ;;  %4061 = vmatprep.subr.bf16.mxu0 %v4446_v48  ;;  %v1188_v17 = vpop.permute.xlu0 %1187  ;;  %v4460_v46 = vld [vmem:[%s5960_s2 + $0x58] sm:$0xff]  }
  0xe5   : > { %4374 = vset.pattern.permute.xlu1 %v4581_v54  ;;  %v1179_v56 = vpop.permute.xlu1 %1178 }
  0xe6   : > { %3555 = vmatmul.mubr.msk.bf16.gmra.mxu1 %vm3554_vm0, %v4583_v53  ;;  %2685 = vperm.xlu1 %4374, %v5014_v1   ;;  %vm1201_vm7 = vcmp.eq.s32.totalorder %v4952_v43, %v1179_v56  ;;  %vm1200_vm15 = vcmp.eq.s32.totalorder %v4908_v16, %v1179_v56 }
  0xe7   : > { %3557 = vmatprep.mubr.msk.bf16.mxu1 %vm3556_vm1, %v4583_v53  ;;  %4013 = vmatpush3.bf16.msra.mxu1 %v4433_v9  ;;  %vm3625_vm14 = vmpackc.low %vm1201_vm7, %vm1199_vm12  ;;  %vm1203_vm1 = vcmp.eq.s32.totalorder %v4952_v43, %v1182_v4  ;;  %vm1279_vm7 = vcmp.eq.s32.totalorder %v4952_v43, %v5048_v22  ;;  %vm1202_vm12 = vcmp.eq.s32.totalorder %v4908_v16, %v1182_v4  ;;  %v4465_v4 = vld [vmem:[%s5960_s2 + $0x8] sm:$0xff]  }
  0xe8   : > { %4014 = vmatprep.subr.bf16.mxu1 %v4436_v50  ;;  %4062 = vmatpush3.bf16.msra.mxu0 %v4447_v52  ;;  %vm3627_vm3 = vmpackc.low %vm1200_vm15, %vm1198_vm2  ;;  %vm1207_vm15 = vcmp.eq.s32.totalorder %v4952_v43, %v1188_v17  ;;  %v1197_v18 = vpop.permute.xlu0 %1196  ;;  %v4462_v52 = vld [vmem:[%s5960_s2 + $0x50] sm:$0xff]  }
  0xe9   : > { %4063 = vmatprep.subr.bf16.mxu0 %v4448_v55  ;;  %v473_v63 = vpop.permute.xlu1 %472 }
  0xea   : > { %4375 = vset.pattern.permute.xlu1 %v4580_v51  ;;  %vm488_vm8 = vcmp.eq.s32.totalorder %v4908_v16, %v473_v63  ;;  %vm489_vm9 = vcmp.eq.s32.totalorder %v4952_v43, %v473_v63  ;;  %v4464_v63 = vld [vmem:[%s5960_s2 + $0x48] sm:$0xff]  }
  0xeb   : > { %4015 = vmatpush3.bf16.msra.mxu1 %v4437_v58  ;;  %2010 = vperm.xlu1 %4375, %v4898_v12   ;;  %vm3519_vm11 = vmpackc.low %vm489_vm9, %vm487_vm5  ;;  %vm1278_vm5 = vcmp.eq.s32.totalorder %v4908_v16, %v5048_v22 }
  0xec   : > { %4016 = vmatprep.subr.bf16.mxu1 %v4440_v59  ;;  %4064 = vmatpush3.bf16.msra.mxu0 %v4449_v60  ;;  %vm3521_vm13 = vmpackc.low %vm488_vm8, %vm486_vm6  ;;  %v4463_v60 = vld [vmem:[%s5960_s2 + $0x10] sm:$0xff]  }
  0xed   : > { %3520 = vmatprep.mubr.msk.bf16.mxu0 %vm3519_vm11, %v4583_v53  ;;  %4279 = vmatprep.subr.bf16.mxu0 %v5200_v62  ;;  %v1185_v12 = vpop.permute.xlu1 %1184 }
  0xee   : > { %3559 = vmatmul.mubr.msk.bf16.gmra.mxu1 %vm3558_vm10, %v4583_v53  ;;  %3522 = vmatmul.mubr.msk.bf16.gmra.mxu0 %vm3521_vm13, %v4583_v53  ;;  %vm1205_vm0 = vcmp.eq.s32.totalorder %v4952_v43, %v1185_v12  ;;  %vm1204_vm11 = vcmp.eq.s32.totalorder %v4908_v16, %v1185_v12 }
  0xef   : > { %4017 = vmatpush3.bf16.msra.mxu1 %v4441_v0  ;;  %3626 = vmatprep.mubr.msk.bf16.mxu1 %vm3625_vm14, %v4583_v53  ;;  %vm3629_vm6 = vmpackc.low %vm1205_vm0, %vm1203_vm1 }
  0xf0   : > { %2013 = vperm.xlu1 %4375, %v4868_v7   ;;  %4018 = vmatprep.subr.bf16.mxu1 %v4444_v2  ;;  %v4451_v7 = vld [vmem:[%s5960_s2 + $0x78] sm:$0xff]   ;;  %vm3631_vm0 = vmpackc.low %vm1204_vm11, %vm1202_vm12 }
  0xf1   : > { %v1191_v6 = vpop.permute.xlu1 %1190 }
  0xf2   : > { %vm1209_vm14 = vcmp.eq.s32.totalorder %v4952_v43, %v1191_v6  ;;  %vm1208_vm2 = vcmp.eq.s32.totalorder %v4908_v16, %v1191_v6 }
  0xf3   : > { %4019 = vmatpush3.bf16.msra.mxu1 %v4445_v3  ;;  %vm3633_vm1 = vmpackc.low %vm1209_vm14, %vm1207_vm15 }
  0xf4   : > { %4377 = vset.pattern.permute.xlu1 %v4581_v54  ;;  %4269 = vmatprep.subr.bf16.mxu1 %v4450_v5 }
  0xf5   : > { %2694 = vperm.xlu1 %4377, %v5238_v14  }
  0xf6   : > { %3628 = vmatmul.mubr.msk.bf16.vlgmr.msra.gmra.mxu1 %vm3627_vm3, %v4583_v53  ;;  %v1259_v54 = vpop.permute.xlu1 %1258  ;;  %vm1206_vm3 = vcmp.eq.s32.totalorder %v4908_v16, %v1188_v17 }
  0xf7   : > { %3630 = vmatprep.mubr.msk.bf16.mxu1 %vm3629_vm6, %v4583_v53  ;;  %4270 = vmatpush3.bf16.msra.mxu1 %v4450_v5  ;;  %vm1280_vm8 = vcmp.eq.s32.totalorder %v4908_v16, %v1259_v54  ;;  %vm1281_vm9 = vcmp.eq.s32.totalorder %v4952_v43, %v1259_v54  ;;  %vm1213_vm6 = vcmp.eq.s32.totalorder %v4952_v43, %v1197_v18  ;;  %v4472_v5 = vld [vmem:[%s5960_s2 + $0x68] sm:$0xff]  }
  0xf8   : > { %4089 = vmatprep.subr.bf16.mxu1 %v4451_v7  ;;  %vm3664_vm10 = vmpackc.low %vm1280_vm8, %vm1278_vm5  ;;  %v4473_v54 = vld [vmem:[%s5960_s2 + $0x28] sm:$0xff]  }
  0xf9   : > { %4378 = vset.pattern.permute.xlu1 %v4580_v51  ;;  %vm3662_vm13 = vmpackc.low %vm1281_vm9, %vm1279_vm7 }
  0xfa   : > { %2019 = vperm.xlu1 %4378, %v4962_v47   ;;  %3663 = vmatprep.mubr.msk.bf16.mxu0 %vm3662_vm13, %v4583_v53  ;;  %v1124_v47 = vpop.permute.xlu0 %1123  ;;  %vm3635_vm7 = vmpackc.low %vm1208_vm2, %vm1206_vm3 }
  0xfb   : > { %3665 = vmatmul.mubr.msk.bf16.vlgmr.msra.gmra.mxu0 %vm3664_vm10, %v4583_v53  ;;  %v1194_v20 = vpop.permute.xlu1 %1193  ;;  %vm1146_vm14 = vcmp.eq.s32.totalorder %v4908_v16, %v1124_v47  ;;  %v4475_v47 = vld [vmem:[%s5961_s3 + $0x78] sm:$0xff]  }
  0xfc   : > { %4280 = vmatpush3.bf16.msra.mxu0 %v5200_v62  ;;  %vm1211_vm5 = vcmp.eq.s32.totalorder %v4952_v43, %v1194_v20  ;;  %v3569_v25 = vsel %vm1146_vm14, 1.0, %v4582_v21  ;;  %v4470_v62 = vld [vmem:[%s5960_s2 + $0x70] sm:$0xff]  }
  0xfd   : > { %4174 = vmatprep.subr.bf16.mxu0 %v4466_v19  ;;  %vm3637_vm8 = vmpackc.low %vm1213_vm6, %vm1211_vm5 }
  0xfe   : > { %2753 = vperm.xlu1 %4378, %v4886_v10   ;;  %3632 = vmatmul.mubr.msk.bf16.gmra.mxu1 %vm3631_vm0, %v4583_v53  ;;  %v1133_v24 = vpop.permute.xlu0 %1132  ;;  %vm1210_vm0 = vcmp.eq.s32.totalorder %v4908_v16, %v1194_v20  ;;  %v4474_v20 = vld [vmem:[%s5960_s2 + $0x60] sm:$0xff]  }
  0xff   : > { %3634 = vmatprep.mubr.msk.bf16.mxu1 %vm3633_vm1, %v4583_v53  ;;  %vm1212_vm1 = vcmp.eq.s32.totalorder %v4908_v16, %v1197_v18  ;;  %vm1149_vm5 = vcmp.eq.s32.totalorder %v4908_v16, %v1133_v24  ;;  %v4469_v18 = vld [vmem:[%s5960_s2] sm:$0xff]  }
 0x100   : > { %v1262_v22 = vpop.permute.xlu1 %1261  ;;  %vm3639_vm3 = vmpackc.low %vm1212_vm1, %vm1210_vm0  ;;  %v3572_v31 = vsel %vm1149_vm5, 1.0, %v4582_v21 }
 0x101   : > { %vm1283_vm9 = vcmp.eq.s32.totalorder %v4952_v43, %v1262_v22  ;;  %vm1282_vm12 = vcmp.eq.s32.totalorder %v4908_v16, %v1262_v22  ;;  %v4476_v22 = vld [vmem:[%s5960_s2 + $0x20] sm:$0xff]  }
 0x102   : > { %2022 = vperm.xlu1 %4378, %v4875_v8   ;;  %v1271_v26 = vpop.permute.xlu0 %1270 }
 0x104   : > { %v1265_v23 = vpop.permute.xlu1 %1264 }
 0x105   : > { %vm1284_vm10 = vcmp.eq.s32.totalorder %v4908_v16, %v1265_v23  ;;  %vm1285_vm11 = vcmp.eq.s32.totalorder %v4952_v43, %v1265_v23  ;;  %v4478_v23 = vld [vmem:[%s5960_s2 + $0x58] sm:$0xff]  }
 0x106   : > { %2759 = vperm.xlu1 %4378, %v4892_v11   ;;  %3636 = vmatmul.mubr.msk.bf16.gmra.mxu1 %vm3635_vm7, %v4583_v53  ;;  %vm3666_vm13 = vmpackc.low %vm1285_vm11, %vm1283_vm9  ;;  %v1873_v30 = vpop.permute.xlu0 %1872  ;;  %vm1289_vm7 = vcmp.eq.s32.totalorder %v4952_v43, %v1271_v26 }
 0x107   : > { %3638 = vmatprep.mubr.msk.bf16.mxu1 %vm3637_vm8, %v4583_v53  ;;  %vm3668_vm15 = vmpackc.low %vm1284_vm10, %vm1282_vm12  ;;  %3667 = vmatprep.mubr.msk.bf16.mxu0 %vm3666_vm13, %v4583_v53  ;;  %vm1288_vm8 = vcmp.eq.s32.totalorder %v4908_v16, %v1271_v26  ;;  %v4479_v26 = vld [vmem:[%s5961_s3 + $0x70] sm:$0xff]  }
 0x108   : > { %3669 = vmatmul.mubr.msk.bf16.gmra.mxu0 %vm3668_vm15, %v4583_v53 }
 0x109   : > { %v1127_v8 = vpop.permute.xlu1 %1126 }
 0x10a   : > { %4379 = vset.pattern.permute.xlu1 %v4579_v32  ;;  %vm1147_vm2 = vcmp.eq.s32.totalorder %v4908_v16, %v1127_v8  ;;  %v1882_v36 = vpop.permute.xlu0 %1881 }
 0x10b   : > { %2621 = vperm.xlu1 %4379, %v4886_v10   ;;  %v3570_v27 = vsel %vm1147_vm2, 1.0, %v4582_v21  ;;  %vm1895_vm2 = vcmp.eq.s32.totalorder %v4908_v16, %v1873_v30  ;;  %v4481_v30 = vld [vmem:[%s5961_s3 + $0x30] sm:$0xff]  }
 0x10c   : > { %v1170_v28 = vpack.c.bf16 %v3570_v27, %v3569_v25  ;;  %v3686_v41 = vsel %vm1895_vm2, 1.0, %v4582_v21  ;;  %v4477_v25 = vld [vmem:[%s5961_s3 + $0x38] sm:$0xff]  }
 0x10d   : > { %v1130_v29 = vpop.permute.xlu1 %1129  ;;  %v4480_v27 = vld [vmem:[%s5960_s2 + $0x18] sm:$0xff]  }
 0x10e   : > { %3640 = vmatmul.mubr.msk.bf16.gmra.mxu1 %vm3639_vm3, %v4583_v53  ;;  %vm1148_vm6 = vcmp.eq.s32.totalorder %v4908_v16, %v1130_v29  ;;  %v1139_v40 = vpop.permute.xlu0 %1138 }
 0x10f   : > { %2627 = vperm.xlu1 %4379, %v4892_v11   ;;  %4271 = vmatprep.mubr.msk.bf16.mxu1 %vm811_vm4, %v1170_v28  ;;  %v3571_v10 = vsel %vm1148_vm6, 1.0, %v4582_v21  ;;  %v4452_v11 = vld [vmem:[%s5960_s2 + $0x38] sm:$0xff]   ;;  %vm1898_vm6 = vcmp.eq.s32.totalorder %v4908_v16, %v1882_v36  ;;  %v4482_v28 = vld [vmem:[%s5960_s2 + $0x50] sm:$0xff]   ;;  %v4486_v36 = vld [vmem:[%s5960_s2 + $0x48] sm:$0xff]  }
 0x110   : > { %v1171_v34 = vpack.c.bf16 %v3572_v31, %v3571_v10  ;;  %v3689_v49 = vsel %vm1898_vm6, 1.0, %v4582_v21  ;;  %v4483_v31 = vld [vmem:[%s5961_s3 + $0x68] sm:$0xff]  }
 0x112   : > { %v1268_v33 = vpop.permute.xlu1 %1267  ;;  %v1145_v44 = vpop.permute.xlu0 %1144 }
 0x113   : > { %2630 = vperm.xlu1 %4379, %v4999_v61   ;;  %vm1286_vm9 = vcmp.eq.s32.totalorder %v4908_v16, %v1268_v33  ;;  %vm1287_vm10 = vcmp.eq.s32.totalorder %v4952_v43, %v1268_v33 }
 0x114   : > { %vm3670_vm11 = vmpackc.low %vm1289_vm7, %vm1287_vm10  ;;  %vm1153_vm10 = vcmp.eq.s32.totalorder %v4908_v16, %v1145_v44 }
 0x115   : > { %vm3672_vm12 = vmpackc.low %vm1288_vm8, %vm1286_vm9  ;;  %3671 = vmatprep.mubr.msk.bf16.mxu0 %vm3670_vm11, %v4583_v53  ;;  %vm1151_vm8 = vcmp.eq.s32.totalorder %v4908_v16, %v1139_v40  ;;  %v3576_v12 = vsel %vm1153_vm10, 1.0, %v4582_v21 }
 0x116   : > { %4272 = vmatmul.mubr.msk.bf16.vlgmr.msra.gmra.mxu1 %vm811_vm4, %v1171_v34  ;;  %v1274_v61 = vpop.permute.xlu1 %1273  ;;  %3673 = vmatmul.mubr.msk.bf16.gmra.mxu0 %vm3672_vm12, %v4583_v53  ;;  %v5361_v56 = vpop.permute.xlu0 %1890  ;;  %v3574_v58 = vsel %vm1151_vm8, 1.0, %v4582_v21 }
 0x117   : > { %4381 = vset.pattern.permute.xlu1 %v4580_v51  ;;  %4090 = vmatpush3.bf16.msra.mxu1 %v4452_v11  ;;  %vm1291_vm13 = vcmp.eq.s32.totalorder %v4952_v43, %v1274_v61  ;;  %vm1290_vm0 = vcmp.eq.s32.totalorder %v4908_v16, %v1274_v61  ;;  %v4484_v11 = vld [vmem:[%s5960_s2 + $0x10] sm:$0xff]  }
 0x118   : > { %2768 = vperm.xlu1 %4381, %v4901_v13   ;;  %4091 = vmatprep.subr.bf16.mxu1 %v4453_v35  ;;  %v4456_v13 = vld [vmem:[%s5960_s2 + $0x28] sm:$0xff]  }
 0x11a   : > { %v1277_v39 = vpop.permute.xlu1 %1276  ;;  %v1928_v6 = vpop.permute.xlu0 %1927 }
 0x11b   : > { %vm1292_vm14 = vcmp.eq.s32.totalorder %v4908_v16, %v1277_v39  ;;  %vm1293_vm15 = vcmp.eq.s32.totalorder %v4952_v43, %v1277_v39  ;;  %4092 = vmatpush3.bf16.msra.mxu1 %v4454_v37  ;;  %vm1950_vm12 = vcmp.eq.s32.totalorder %v4952_v43, %v1928_v6  ;;  %v4487_v39 = vld [vmem:[%s5961_s3 + $0x60] sm:$0xff]  }
 0x11c   : > { %4382 = vset.pattern.permute.xlu1 %v4579_v32  ;;  %vm3674_vm1 = vmpackc.low %vm1293_vm15, %vm1291_vm13  ;;  %4093 = vmatprep.subr.bf16.mxu1 %v4455_v38  ;;  %v4457_v32 = vld [vmem:[%s5960_s2 + $0x60] sm:$0xff]   ;;  %v4485_v38 = vld [vmem:[%s5961_s3 + $0x28] sm:$0xff]  }
 0x11d   : > { %2633 = vperm.xlu1 %4382, %v5014_v1   ;;  %vm3676_vm3 = vmpackc.low %vm1292_vm14, %vm1290_vm0  ;;  %3675 = vmatprep.mubr.msk.bf16.mxu0 %vm3674_vm1, %v4583_v53  ;;  %v4459_v1 = vld [vmem:[%s5960_s2 + $0x20] sm:$0xff]   ;;  %vm1949_vm0 = vcmp.eq.s32.totalorder %v4908_v16, %v1928_v6 }
 0x11e   : > { %3677 = vmatmul.mubr.msk.bf16.gmra.mxu0 %vm3676_vm3, %v4583_v53  ;;  %v1934_v24 = vpop.permute.xlu0 %1933  ;;  %vm1901_vm3 = vcmp.eq.s32.totalorder %v4908_v16, %v5361_v56  ;;  %v4496_v56 = vld [vmem:[%s5961_s3 + $0x48] sm:$0xff]  }
 0x11f   : > { %v1876_v42 = vpop.permute.xlu1 %1875  ;;  %4094 = vmatpush3.bf16.msra.mxu1 %v4456_v13  ;;  %v3692_v61 = vsel %vm1901_vm3, 1.0, %v4582_v21  ;;  %v4488_v13 = vld [vmem:[%s5960_s2 + $0x8] sm:$0xff]   ;;  %vm1953_vm8 = vcmp.eq.s32.totalorder %v4908_v16, %v1934_v24 }
 0x120   : > { %vm1896_vm5 = vcmp.eq.s32.totalorder %v4908_v16, %v1876_v42  ;;  %4095 = vmatprep.subr.bf16.mxu1 %v4457_v32  ;;  %v4490_v42 = vld [vmem:[%s5960_s2 + $0x40] sm:$0xff]  }
 0x121   : > { %2639 = vperm.xlu1 %4382, %v4906_v15   ;;  %v3687_v45 = vsel %vm1896_vm5, 1.0, %v4582_v21  ;;  %v4461_v15 = vld [vmem:[%s5960_s2 + $0x18] sm:$0xff]  }
 0x122   : > { %v1919_v48 = vpack.c.bf16 %v3687_v45, %v3686_v41  ;;  %v5439_v10 = vpop.permute.xlu0 %2673  ;;  %v4491_v45 = vld [vmem:[%s5961_s3 + $0x58] sm:$0xff]  }
 0x123   : > { %v1879_v9 = vpop.permute.xlu1 %1878  ;;  %4096 = vmatpush3.bf16.msra.mxu1 %v4459_v1  ;;  %v4489_v1 = vld [vmem:[%s5961_s3 + $0x20] sm:$0xff]  }
 0x124   : > { %vm1897_vm7 = vcmp.eq.s32.totalorder %v4908_v16, %v1879_v9  ;;  %4281 = vmatprep.mubr.msk.bf16.mxu0 %vm811_vm4, %v1919_v48  ;;  %4097 = vmatprep.subr.bf16.mxu1 %v4460_v46  ;;  %v4492_v46 = vld [vmem:[%s5960_s2] sm:$0xff]   ;;  %v4499_v48 = vld [vmem:[%s5961_s3 + $0x78] sm:$0xff]  }
 0x125   : > { %2642 = vperm.xlu1 %4382, %v5238_v14   ;;  %v3688_v50 = vsel %vm1897_vm7, 1.0, %v4582_v21  ;;  %vm1954_vm7 = vcmp.eq.s32.totalorder %v4952_v43, %v1934_v24  ;;  %v4493_v9 = vld [vmem:[%s5961_s3 + $0x18] sm:$0xff]   ;;  %v4512_v24 = vld [vmem:[%s5961_s3 + $0x48] sm:$0xff]  }
 0x126   : > { %v1920_v55 = vpack.c.bf16 %v3689_v49, %v3688_v50  ;;  %v5468_v32 = vpop.permute.xlu0 %1942  ;;  %v4494_v50 = vld [vmem:[%s5961_s3 + $0x50] sm:$0xff]  }
 0x127   : > { %v1136_v59 = vpop.permute.xlu1 %1135  ;;  %4098 = vmatpush3.bf16.msra.mxu1 %v4461_v15 }
 0x128   : > { %vm1150_vm9 = vcmp.eq.s32.totalorder %v4908_v16, %v1136_v59  ;;  %4282 = vmatmul.mubr.msk.bf16.vlgmr.msra.gmra.mxu0 %vm811_vm4, %v1920_v55  ;;  %4099 = vmatprep.subr.bf16.mxu1 %v4462_v52  ;;  %v4495_v52 = vld [vmem:[%s5961_s3 + $0x10] sm:$0xff]  }
 0x129   : > { %4384 = vset.pattern.permute.xlu1 %v4580_v51  ;;  %v3573_v0 = vsel %vm1150_vm9, 1.0, %v4582_v21  ;;  %4175 = vmatpush3.bf16.msra.mxu0 %v4467_v57  ;;  %v4471_v51 = vld [vmem:[%s5960_s2 + $0x30] sm:$0xff]  }
 0x12a   : > { %2774 = vperm.xlu1 %4384, %v5238_v14   ;;  %v1172_v2 = vpack.c.bf16 %v3574_v58, %v3573_v0  ;;  %4176 = vmatprep.subr.bf16.mxu0 %v4470_v62  ;;  %v4468_v14 = vld [vmem:[%s5960_s2 + $0x40] sm:$0xff]   ;;  %v5491_v49 = vpop.permute.xlu0 %2679  ;;  %v4497_v58 = vld [vmem:[%s5961_s3 + $0x8] sm:$0xff]   ;;  %v4501_v62 = vld [vmem:[%s5961_s3 + $0x38] sm:$0xff]  }
 0x12b   : > { %v1142_v3 = vpop.permute.xlu1 %1141  ;;  %4100 = vmatpush3.bf16.msra.mxu1 %v4463_v60  ;;  %v4498_v60 = vld [vmem:[%s5961_s3 + $0x40] sm:$0xff]  }
 0x12c   : > { %vm1152_vm11 = vcmp.eq.s32.totalorder %v4908_v16, %v1142_v3  ;;  %4275 = vmatprep.mubr.msk.bf16.mxu1 %vm811_vm4, %v1172_v2  ;;  %4101 = vmatprep.subr.bf16.mxu1 %v4464_v63  ;;  %v4502_v63 = vld [vmem:[%s5961_s3 + $0x70] sm:$0xff]   ;;  %v4500_v2 = vld [vmem:[%s5961_s3] sm:$0xff]  }
 0x12d   : > { %v3575_v7 = vsel %vm1152_vm11, 1.0, %v4582_v21  ;;  %4177 = vmatpush3.bf16.msra.mxu0 %v4471_v51  ;;  %v4503_v3 = vld [vmem:[%s5961_s3 + $0x30] sm:$0xff]  }
 0x12e   : > { %v1173_v17 = vpack.c.bf16 %v3576_v12, %v3575_v7  ;;  %4178 = vmatprep.subr.bf16.mxu0 %v4472_v5  ;;  %v5509_v57 = vpop.permute.xlu0 %2688  ;;  %v4516_v12 = vld [vmem:[%s5959_s1] sm:$0xff]  }
 0x12f   : > { %4102 = vmatpush3.bf16.msra.mxu1 %v4465_v4  ;;  %v4504_v4 = vld [vmem:[%s5961_s3 + $0x68] sm:$0xff]   ;;  %v4506_v7 = vld [vmem:[%s5961_s3 + $0x60] sm:$0xff]  }
 0x130   : > { %v1925_v19 = vpop.permute.xlu1 %1924  ;;  %4276 = vmatmul.mubr.msk.bf16.gmra.mxu1 %vm811_vm4, %v1173_v17  ;;  %4103 = vmatprep.subr.bf16.mxu1 %v4468_v14  ;;  %v4505_v14 = vld [vmem:[%s5961_s3 + $0x28] sm:$0xff]  }
 0x131   : > { %vm1948_vm13 = vcmp.eq.s32.totalorder %v4952_v43, %v1925_v19  ;;  %4179 = vmatpush3.bf16.msra.mxu0 %v4473_v54  ;;  %vm1947_vm15 = vcmp.eq.s32.totalorder %v4908_v16, %v1925_v19  ;;  %v4507_v54 = vld [vmem:[%s5961_s3 + $0x20] sm:$0xff]   ;;  %v4509_v19 = vld [vmem:[%s5961_s3 + $0x18] sm:$0xff]  }
 0x132   : > { %vm3742_vm14 = vmpackc.low %vm1950_vm12, %vm1948_vm13  ;;  %4180 = vmatprep.subr.bf16.mxu0 %v4474_v20  ;;  %v5535_v0 = vpop.permute.xlu0 %2691 }
 0x133   : > { %3743 = vmatprep.mubr.msk.bf16.mxu1 %vm3742_vm14, %v4583_v53  ;;  %4104 = vmatpush3.bf16.msra.mxu1 %v4469_v18  ;;  %vm3744_vm1 = vmpackc.low %vm1949_vm0, %vm1947_vm15  ;;  %v4508_v18 = vld [vmem:[%s5961_s3 + $0x58] sm:$0xff]  }
 0x134   : > { %4134 = vmatprep.subr.bf16.mxu1 %v4475_v47  ;;  %v4510_v47 = vld [vmem:[%s5961_s3 + $0x50] sm:$0xff]  }
 0x135   : > { %v1885_v8 = vpop.permute.xlu1 %1884  ;;  %4181 = vmatpush3.bf16.msra.mxu0 %v4476_v22 }
 0x136   : > { %4182 = vmatprep.subr.bf16.mxu0 %v4478_v23  ;;  %vm1899_vm2 = vcmp.eq.s32.totalorder %v4908_v16, %v1885_v8  ;;  %v2005_v6 = vpop.permute.xlu0 %2004  ;;  %v4511_v23 = vld [vmem:[%s5961_s3 + $0x10] sm:$0xff]  }
 0x137   : > { %v3690_v33 = vsel %vm1899_vm2, 1.0, %v4582_v21  ;;  %vm2697_vm2 = vcmp.eq.s32.totalorder %v4952_v43, %v5439_v10 }
 0x138   : > { %3745 = vmatmul.mubr.msk.bf16.vlgmr.msra.gmra.mxu1 %vm3744_vm1, %v4583_v53 }
 0x139   : > { %v1888_v29 = vpop.permute.xlu1 %1887  ;;  %4135 = vmatpush3.bf16.msra.mxu1 %v4477_v25  ;;  %4183 = vmatpush3.bf16.msra.mxu0 %v4480_v27  ;;  %v4513_v25 = vld [vmem:[%s5961_s3 + $0x8] sm:$0xff]  }
 0x13a   : > { %vm1900_vm5 = vcmp.eq.s32.totalorder %v4908_v16, %v1888_v29  ;;  %4136 = vmatprep.subr.bf16.mxu1 %v4479_v26  ;;  %4184 = vmatprep.subr.bf16.mxu0 %v4482_v28  ;;  %v2017_v22 = vpop.permute.xlu0 %2016  ;;  %v4514_v26 = vld [vmem:[%s5961_s3 + $0x40] sm:$0xff]  }
 0x13b   : > { %v3691_v34 = vsel %vm1900_vm5, 1.0, %v4582_v21  ;;  %vm2696_vm5 = vcmp.eq.s32.totalorder %v4908_v16, %v5439_v10  ;;  %v4515_v29 = vld [vmem:[%s5961_s3] sm:$0xff]  }
 0x13c   : > { %v1921_v35 = vpack.c.bf16 %v3691_v34, %v3690_v33 }
 0x13d   : > { %v1894_v37 = vpop.permute.xlu1 %1893  ;;  %4137 = vmatpush3.bf16.msra.mxu1 %v4481_v30  ;;  %4185 = vmatpush3.bf16.msra.mxu0 %v4484_v11 }
 0x13e   : > { %vm1902_vm6 = vcmp.eq.s32.totalorder %v4908_v16, %v1894_v37  ;;  %4285 = vmatprep.mubr.msk.bf16.mxu0 %vm811_vm4, %v1921_v35  ;;  %4138 = vmatprep.subr.bf16.mxu1 %v4483_v31  ;;  %v2757_v27 = vpop.permute.xlu0 %2756 }
 0x13f   : > { %v3693_v40 = vsel %vm1902_vm6, 1.0, %v4582_v21  ;;  %4186 = vmatprep.subr.bf16.mxu0 %v4486_v36 }
 0x140   : > { %v1922_v41 = vpack.c.bf16 %v3693_v40, %v3692_v61 }
 0x141   : > { %4139 = vmatpush3.bf16.msra.mxu1 %v4485_v38  ;;  %4187 = vmatpush3.bf16.msra.mxu0 %v4488_v13 }
 0x142   : > { %v1931_v44 = vpop.permute.xlu1 %1930  ;;  %4286 = vmatmul.mubr.msk.bf16.gmra.mxu0 %vm811_vm4, %v1922_v41  ;;  %4140 = vmatprep.subr.bf16.mxu1 %v4487_v39  ;;  %v2026_v10 = vpop.permute.xlu0 %2025 }
 0x143   : > { %vm1951_vm9 = vcmp.eq.s32.totalorder %v4908_v16, %v1931_v44  ;;  %vm1952_vm10 = vcmp.eq.s32.totalorder %v4952_v43, %v1931_v44  ;;  %4188 = vmatprep.subr.bf16.mxu0 %v4490_v42 }
 0x144   : > { %vm3746_vm11 = vmpackc.low %vm1954_vm7, %vm1952_vm10 }
 0x145   : > { %vm3748_vm12 = vmpackc.low %vm1953_vm8, %vm1951_vm9  ;;  %3747 = vmatprep.mubr.msk.bf16.mxu1 %vm3746_vm11, %v4583_v53  ;;  %4141 = vmatpush3.bf16.msra.mxu1 %v4489_v1  ;;  %vm1960_vm9 = vcmp.eq.s32.totalorder %v4952_v43, %v5468_v32  ;;  %vm1959_vm11 = vcmp.eq.s32.totalorder %v4908_v16, %v5468_v32 }
 0x146   : > { %v1937_v15 = vpop.permute.xlu1 %1936  ;;  %3749 = vmatmul.mubr.msk.bf16.gmra.mxu1 %vm3748_vm12, %v4583_v53  ;;  %4142 = vmatprep.subr.bf16.mxu1 %v4491_v45  ;;  %v2763_v33 = vpop.permute.xlu0 %2762 }
 0x147   : > { %4189 = vmatpush3.bf16.msra.mxu0 %v4492_v46  ;;  %vm1956_vm13 = vcmp.eq.s32.totalorder %v4952_v43, %v1937_v15  ;;  %vm1955_vm0 = vcmp.eq.s32.totalorder %v4908_v16, %v1937_v15 }
 0x148   : > { %4219 = vmatprep.subr.bf16.mxu0 %v4499_v48 }
 0x149   : > { %4143 = vmatpush3.bf16.msra.mxu1 %v4493_v9 }
 0x14a   : > { %v1940_v55 = vpop.permute.xlu1 %1939  ;;  %4144 = vmatprep.subr.bf16.mxu1 %v4494_v50  ;;  %v2766_v36 = vpop.permute.xlu0 %2765 }
 0x14b   : > { %vm1957_vm14 = vcmp.eq.s32.totalorder %v4908_v16, %v1940_v55  ;;  %vm1958_vm15 = vcmp.eq.s32.totalorder %v4952_v43, %v1940_v55 }
 0x14c   : > { %vm3750_vm1 = vmpackc.low %vm1958_vm15, %vm1956_vm13  ;;  %vm2701_vm15 = vcmp.eq.s32.totalorder %v4952_v43, %v5491_v49 }
 0x14d   : > { %vm3752_vm3 = vmpackc.low %vm1957_vm14, %vm1955_vm0  ;;  %3751 = vmatprep.mubr.msk.bf16.mxu1 %vm3750_vm1, %v4583_v53  ;;  %4145 = vmatpush3.bf16.msra.mxu1 %v4495_v52  ;;  %vm2700_vm1 = vcmp.eq.s32.totalorder %v4908_v16, %v5491_v49 }
 0x14e   : > { %v2677_v59 = vpop.permute.xlu1 %2676  ;;  %3753 = vmatmul.mubr.msk.bf16.gmra.mxu1 %vm3752_vm3, %v4583_v53  ;;  %4146 = vmatprep.subr.bf16.mxu1 %v4496_v56  ;;  %v2625_v38 = vpop.permute.xlu0 %2624 }
 0x14f   : > { %vm2698_vm6 = vcmp.eq.s32.totalorder %v4908_v16, %v2677_v59  ;;  %vm2699_vm7 = vcmp.eq.s32.totalorder %v4952_v43, %v2677_v59 }
 0x150   : > { %vm3859_vm8 = vmpackc.low %vm2699_vm7, %vm2697_vm2  ;;  %vm2028_vm7 = vcmp.eq.s32.totalorder %v4952_v43, %v2005_v6 }
 0x151   : > { %vm3861_vm10 = vmpackc.low %vm2698_vm6, %vm2696_vm5  ;;  %3860 = vmatprep.mubr.msk.bf16.mxu0 %vm3859_vm8, %v4583_v53  ;;  %4147 = vmatpush3.bf16.msra.mxu1 %v4497_v58  ;;  %vm2027_vm8 = vcmp.eq.s32.totalorder %v4908_v16, %v2005_v6  ;;  %v5691_v6 = vld [vmem:[%s5962_s4] ss:$0 sm:$0xff] }
 0x152   : > { %3862 = vmatmul.mubr.msk.bf16.vlgmr.msra.gmra.mxu0 %vm3861_vm10, %v4583_v53  ;;  %4148 = vmatprep.subr.bf16.mxu1 %v4498_v60  ;;  %v2637_v56 = vpop.permute.xlu0 %2636 }
 0x153   : > { %v1946_v51 = vpop.permute.xlu1 %1945  ;;  %4220 = vmatpush3.bf16.msra.mxu0 %v4501_v62 }
 0x154   : > { %vm1961_vm12 = vcmp.eq.s32.totalorder %v4908_v16, %v1946_v51  ;;  %vm1962_vm13 = vcmp.eq.s32.totalorder %v4952_v43, %v1946_v51  ;;  %4221 = vmatprep.subr.bf16.mxu0 %v4502_v63 }
 0x155   : > { %vm3754_vm14 = vmpackc.low %vm1962_vm13, %vm1960_vm9  ;;  %4149 = vmatpush3.bf16.msra.mxu1 %v4500_v2  ;;  %vm2707_vm13 = vcmp.eq.s32.totalorder %v4952_v43, %v5509_v57 }
 0x156   : > { %vm3756_vm0 = vmpackc.low %vm1961_vm12, %vm1959_vm11  ;;  %3755 = vmatprep.mubr.msk.bf16.mxu1 %vm3754_vm14, %v4583_v53  ;;  %4289 = vmatprep.subr.bf16.mxu1 %v4516_v12 }
 0x157   : > { %v2683_v5 = vpop.permute.xlu1 %2682  ;;  %3757 = vmatmul.mubr.msk.bf16.gmra.mxu1 %vm3756_vm0, %v4583_v53  ;;  %4222 = vmatpush3.bf16.msra.mxu0 %v4503_v3  ;;  %vm2706_vm0 = vcmp.eq.s32.totalorder %v4908_v16, %v5509_v57 }
 0x158   : > { %vm2702_vm2 = vcmp.eq.s32.totalorder %v4908_v16, %v2683_v5  ;;  %vm2703_vm3 = vcmp.eq.s32.totalorder %v4952_v43, %v2683_v5  ;;  %4223 = vmatprep.subr.bf16.mxu0 %v4504_v4 }
 0x159   : > { %vm3863_vm5 = vmpackc.low %vm2703_vm3, %vm2701_vm15 }
 0x15a   : > { %vm3865_vm6 = vmpackc.low %vm2702_vm2, %vm2700_vm1  ;;  %3864 = vmatprep.mubr.msk.bf16.mxu0 %vm3863_vm5, %v4583_v53 }
 0x15b   : > { %3866 = vmatmul.mubr.msk.bf16.gmra.mxu0 %vm3865_vm6, %v4583_v53 }
 0x15c   : > { %v2008_v17 = vpop.permute.xlu1 %2007  ;;  %4224 = vmatpush3.bf16.msra.mxu0 %v4505_v14 }
 0x15d   : > { %vm2029_vm9 = vcmp.eq.s32.totalorder %v4908_v16, %v2008_v17  ;;  %vm2030_vm10 = vcmp.eq.s32.totalorder %v4952_v43, %v2008_v17  ;;  %4225 = vmatprep.subr.bf16.mxu0 %v4506_v7 }
 0x15e   : > { %vm3779_vm11 = vmpackc.low %vm2030_vm10, %vm2028_vm7  ;;  %vm2709_vm10 = vcmp.eq.s32.totalorder %v4952_v43, %v5535_v0 }
 0x15f   : > { %vm3781_vm12 = vmpackc.low %vm2029_vm9, %vm2027_vm8  ;;  %3780 = vmatprep.mubr.msk.bf16.mxu1 %vm3779_vm11, %v4583_v53 }
 0x160   : > { %3782 = vmatmul.mubr.msk.bf16.vlgmr.msra.gmra.mxu1 %vm3781_vm12, %v4583_v53  ;;  %4226 = vmatpush3.bf16.msra.mxu0 %v4507_v54 }
 0x161   : > { %v2686_v20 = vpop.permute.xlu1 %2685  ;;  %4227 = vmatprep.subr.bf16.mxu0 %v4508_v18  ;;  %4290 = vmatpush3.bf16.msra.mxu1 %v4516_v12 }
 0x162   : > { %vm2704_vm14 = vcmp.eq.s32.totalorder %v4908_v16, %v2686_v20  ;;  %vm2705_vm15 = vcmp.eq.s32.totalorder %v4952_v43, %v2686_v20 }
 0x163   : > { %vm3867_vm1 = vmpackc.low %vm2707_vm13, %vm2705_vm15  ;;  %vm2708_vm13 = vcmp.eq.s32.totalorder %v4908_v16, %v5535_v0 }
 0x164   : > { %vm3869_vm2 = vmpackc.low %vm2706_vm0, %vm2704_vm14  ;;  %3868 = vmatprep.mubr.msk.bf16.mxu0 %vm3867_vm1, %v4583_v53  ;;  %4228 = vmatpush3.bf16.msra.mxu0 %v4509_v19  ;;  %vm2036_vm0 = vcmp.eq.s32.totalorder %v4952_v43, %v2017_v22  ;;  %vm2035_vm1 = vcmp.eq.s32.totalorder %v4908_v16, %v2017_v22 }
 0x165   : > { %3870 = vmatmul.mubr.msk.bf16.gmra.mxu0 %vm3869_vm2, %v4583_v53  ;;  %4229 = vmatprep.subr.bf16.mxu0 %v4510_v47 }
 0x166   : > { %v2011_v8 = vpop.permute.xlu1 %2010 }
 0x167   : > { %vm2032_vm3 = vcmp.eq.s32.totalorder %v4952_v43, %v2011_v8  ;;  %vm2031_vm7 = vcmp.eq.s32.totalorder %v4908_v16, %v2011_v8 }
 0x168   : > { %4230 = vmatpush3.bf16.msra.mxu0 %v4511_v23 }
 0x169   : > { %4231 = vmatprep.subr.bf16.mxu0 %v4512_v24 }
 0x16b   : > { %v2014_v28 = vpop.permute.xlu1 %2013 }
 0x16c   : > { %vm2033_vm5 = vcmp.eq.s32.totalorder %v4908_v16, %v2014_v28  ;;  %vm2034_vm6 = vcmp.eq.s32.totalorder %v4952_v43, %v2014_v28  ;;  %4232 = vmatpush3.bf16.msra.mxu0 %v4513_v25 }
 0x16d   : > { %vm3783_vm8 = vmpackc.low %vm2034_vm6, %vm2032_vm3  ;;  %4233 = vmatprep.subr.bf16.mxu0 %v4514_v26  ;;  %vm2779_vm6 = vcmp.eq.s32.totalorder %v4952_v43, %v2757_v27 }
 0x16e   : > { %vm3785_vm9 = vmpackc.low %vm2033_vm5, %vm2031_vm7  ;;  %3784 = vmatprep.mubr.msk.bf16.mxu1 %vm3783_vm8, %v4583_v53  ;;  %vm2778_vm8 = vcmp.eq.s32.totalorder %v4908_v16, %v2757_v27 }
 0x16f   : > { %3786 = vmatmul.mubr.msk.bf16.gmra.mxu1 %vm3785_vm9, %v4583_v53 }
 0x170   : > { %v2695_v30 = vpop.permute.xlu1 %2694  ;;  %4234 = vmatpush3.bf16.msra.mxu0 %v4515_v29 }
 0x171   : > { %vm2710_vm11 = vcmp.eq.s32.totalorder %v4908_v16, %v2695_v30  ;;  %vm2711_vm12 = vcmp.eq.s32.totalorder %v4952_v43, %v2695_v30 }
 0x172   : > { %vm3871_vm14 = vmpackc.low %vm2711_vm12, %vm2709_vm10 }
 0x173   : > { %vm3873_vm15 = vmpackc.low %vm2710_vm11, %vm2708_vm13  ;;  %3872 = vmatprep.mubr.msk.bf16.mxu0 %vm3871_vm14, %v4583_v53  ;;  %vm2042_vm13 = vcmp.eq.s32.totalorder %v4952_v43, %v2026_v10 }
 0x174   : > { %3874 = vmatmul.mubr.msk.bf16.gmra.mxu0 %vm3873_vm15, %v4583_v53 }
 0x175   : > { %v2020_v31 = vpop.permute.xlu1 %2019 }
 0x176   : > { %vm2037_vm2 = vcmp.eq.s32.totalorder %v4908_v16, %v2020_v31  ;;  %vm2038_vm3 = vcmp.eq.s32.totalorder %v4952_v43, %v2020_v31  ;;  %v5633_v34 = vpop.f32.mrf.mxu1 }
 0x177   : > { %vm3787_vm5 = vmpackc.low %vm2038_vm3, %vm2036_vm0  ;;  %vm2041_vm0 = vcmp.eq.s32.totalorder %v4908_v16, %v2026_v10  ;;  %vm2783_vm3 = vcmp.eq.s32.totalorder %v4952_v43, %v2763_v33 }
 0x178   : > { %vm3789_vm7 = vmpackc.low %vm2037_vm2, %vm2035_vm1  ;;  %3788 = vmatprep.mubr.msk.bf16.mxu1 %vm3787_vm5, %v4583_v53  ;;  %v5640_v35 = vpop.f32.mrf.mxu1 }
 0x179   : > { %v2754_v11 = vpop.permute.xlu1 %2753  ;;  %3790 = vmatmul.mubr.msk.bf16.gmra.mxu1 %vm3789_vm7, %v4583_v53  ;;  %vm2782_vm7 = vcmp.eq.s32.totalorder %v4908_v16, %v2763_v33  ;;  %v2772_v33 = vpop.permute.xlu0 %2771 }
 0x17a   : > { %vm2776_vm9 = vcmp.eq.s32.totalorder %v4908_v16, %v2754_v11  ;;  %vm2777_vm10 = vcmp.eq.s32.totalorder %v4952_v43, %v2754_v11  ;;  %v5648_v37 = vpop.f32.mrf.mxu1 }
 0x17b   : > { %vm3896_vm11 = vmpackc.low %vm2779_vm6, %vm2777_vm10 }
 0x17c   : > { %vm3898_vm12 = vmpackc.low %vm2778_vm8, %vm2776_vm9  ;;  %3897 = vmatprep.mubr.msk.bf16.mxu0 %vm3896_vm11, %v4583_v53  ;;  %vm2645_vm9 = vcmp.eq.s32.totalorder %v4908_v16, %v2625_v38  ;;  %v861_v40 = vpop.f32.mrf.mxu1 }
 0x17d   : > { %v2023_v61 = vpop.permute.xlu1 %2022  ;;  %3899 = vmatmul.mubr.msk.bf16.vlgmr.msra.gmra.mxu0 %vm3898_vm12, %v4583_v53  ;;  %v3804_v32 = vsel %vm2645_vm9, 1.0, %v4582_v21 }
 0x17e   : > { %vm2039_vm14 = vcmp.eq.s32.totalorder %v4908_v16, %v2023_v61  ;;  %vm2040_vm15 = vcmp.eq.s32.totalorder %v4952_v43, %v2023_v61  ;;  %v5661_v41 = vpop.f32.mrf.mxu1 }
 0x17f   : > { %vm3791_vm1 = vmpackc.low %vm2042_vm13, %vm2040_vm15 }
 0x180   : > { %vm3793_vm2 = vmpackc.low %vm2041_vm0, %vm2039_vm14  ;;  %3792 = vmatprep.mubr.msk.bf16.mxu1 %vm3791_vm1, %v4583_v53  ;;  %v5665_v45 = vpop.f32.mrf.mxu1  ;;  %vm2785_vm14 = vcmp.eq.s32.totalorder %v4952_v43, %v2766_v36  ;;  %vm2784_vm1 = vcmp.eq.s32.totalorder %v4908_v16, %v2766_v36 }
 0x181   : > { %v2760_v39 = vpop.permute.xlu1 %2759  ;;  %3794 = vmatmul.mubr.msk.bf16.gmra.mxu1 %vm3793_vm2, %v4583_v53 }
 0x182   : > { %vm2780_vm5 = vcmp.eq.s32.totalorder %v4908_v16, %v2760_v39  ;;  %vm2781_vm6 = vcmp.eq.s32.totalorder %v4952_v43, %v2760_v39  ;;  %v5669_v9 = vpop.f32.mrf.mxu1 }
 0x183   : > { %vm3900_vm8 = vmpackc.low %vm2783_vm3, %vm2781_vm6  ;;  %vm2649_vm3 = vcmp.eq.s32.totalorder %v4908_v16, %v2637_v56 }
 0x184   : > { %vm3902_vm10 = vmpackc.low %vm2782_vm7, %vm2780_vm5  ;;  %3901 = vmatprep.mubr.msk.bf16.mxu0 %vm3900_vm8, %v4583_v53  ;;  %v5675_v58 = vpop.f32.mrf.mxu1  ;;  %v3808_v63 = vsel %vm2649_vm3, 1.0, %v4582_v21  ;;  %vm1104_vm7 = vcmask 261120  }
 0x185   : > { %3903 = vmatmul.mubr.msk.bf16.gmra.mxu0 %vm3902_vm10, %v4583_v53  ;;  %vm2788_vm10 = vcmp.eq.s32.totalorder %v4908_v16, %v2772_v33 }
 0x186   : > { %v2622_v13 = vpop.permute.xlu1 %2621 }
 0x187   : > { %vm2644_vm11 = vcmp.eq.s32.totalorder %v4908_v16, %v2622_v13 }
 0x188   : > { %v3803_v42 = vsel %vm2644_vm11, 1.0, %v4582_v21  ;;  %vm2789_vm11 = vcmp.eq.s32.totalorder %v4952_v43, %v2772_v33 }
 0x189   : > { %v2668_v1 = vpack.c.bf16 %v3804_v32, %v3803_v42  ;;  %v3935_v46 = vpop.f32.mrf.mxu0 }
 0x18a   : > { %v2628_v44 = vpop.permute.xlu1 %2627 }
 0x18b   : > { %4291 = vmatprep.mubr.msk.bf16.mxu1 %vm811_vm4, %v2668_v1  ;;  %vm2646_vm12 = vcmp.eq.s32.totalorder %v4908_v16, %v2628_v44  ;;  %v3936_v48 = vpop.f32.mrf.mxu0 }
 0x18c   : > { %v3805_v15 = vsel %vm2646_vm12, 1.0, %v4582_v21  ;;  %v3937_v59 = vadd.f32 %v3936_v48, %v3935_v46 }
 0x18d   : > { %v3938_v55 = vpop.f32.mrf.mxu0 }
 0x18e   : > { %v2631_v49 = vpop.permute.xlu1 %2630  ;;  %v859_v51 = vadd.f32 %v3937_v59, %v5640_v35 }
 0x18f   : > { %vm2647_vm13 = vcmp.eq.s32.totalorder %v4908_v16, %v2631_v49  ;;  %v3939_v60 = vpop.f32.mrf.mxu0 }
 0x190   : > { %v3806_v50 = vsel %vm2647_vm13, 1.0, %v4582_v21  ;;  %v3940_v12 = vadd.f32 %v3939_v60, %v3938_v55 }
 0x191   : > { %v2669_v52 = vpack.c.bf16 %v3806_v50, %v3805_v15 }
 0x192   : > { %v862_v47 = vadd.f32 %v3940_v12, %v861_v40 }
 0x193   : > { %v2769_v57 = vpop.permute.xlu1 %2768  ;;  %4292 = vmatmul.mubr.msk.bf16.vlgmr.msra.gmra.mxu1 %vm811_vm4, %v2669_v52 }
 0x194   : > { %vm2786_vm15 = vcmp.eq.s32.totalorder %v4908_v16, %v2769_v57  ;;  %vm2787_vm0 = vcmp.eq.s32.totalorder %v4952_v43, %v2769_v57 }
 0x195   : > { %vm3904_vm2 = vmpackc.low %vm2787_vm0, %vm2785_vm14  ;;  %vm2602_vm0 = vcmask 785920  }
 0x196   : > { %vm3906_vm5 = vmpackc.low %vm2786_vm15, %vm2784_vm1  ;;  %v3980_v62 = vpop.f32.mrf.mxu1  ;;  %3905 = vmatprep.mubr.msk.bf16.mxu0 %vm3904_vm2, %v4583_v53  ;;  %vm3351_vm1 = vcmask 1048320  }
 0x197   : > { %3907 = vmatmul.mubr.msk.bf16.gmra.mxu0 %vm3906_vm5, %v4583_v53 }
 0x198   : > { %v2634_v0 = vpop.permute.xlu1 %2633  ;;  %v3981_v2 = vpop.f32.mrf.mxu1 }
 0x199   : > { %vm2648_vm6 = vcmp.eq.s32.totalorder %v4908_v16, %v2634_v0  ;;  %v3982_v3 = vadd.f32 %v3981_v2, %v3980_v62  ;;  %v3941_v4 = vpop.f32.mrf.mxu0 }
 0x19a   : > { %v3807_v5 = vsel %vm2648_vm6, 1.0, %v4582_v21  ;;  %v3983_v14 = vpop.f32.mrf.mxu1 }
 0x19b   : > { %v2670_v7 = vpack.c.bf16 %v3808_v63, %v3807_v5  ;;  %v1082_v17 = vadd.f32 %v3982_v3, %v859_v51  ;;  %v3942_v54 = vpop.f32.mrf.mxu0 }
 0x19c   : > { %v3943_v18 = vadd.f32 %v3942_v54, %v3941_v4  ;;  %v2640_v19 = vpop.permute.xlu1 %2639  ;;  %v3984_v20 = vpop.f32.mrf.mxu1 }
 0x19d   : > { %v1096_v22 = vadd.f32 %v5691_v6, %v1082_v17  ;;  %v3985_v23 = vadd.f32 %v3984_v20, %v3983_v14  ;;  %v3944_v24 = vpop.f32.mrf.mxu0  ;;  %4295 = vmatprep.mubr.msk.bf16.mxu1 %vm811_vm4, %v2670_v7  ;;  %vm2650_vm8 = vcmp.eq.s32.totalorder %v4908_v16, %v2640_v19 }
 0x19e   : > { %v3986_v8 = vpop.f32.mrf.mxu1  ;;  %v867_v27 = vadd.f32 %v5633_v34, %v3943_v18  ;;  %v3809_v11 = vsel %vm2650_vm8, 1.0, %v4582_v21 }
 0x19f   : > { %v1083_v25 = vadd.f32 %v3985_v23, %v862_v47  ;;  %v3945_v26 = vpop.f32.mrf.mxu0  ;;  %1105 = vst.msk [vmem:[%s5696_s30] sm:$0xff] %vm1104_vm7, %v1096_v22 }
 0x1a0   : > { %v2643_v28 = vpop.permute.xlu1 %2642  ;;  %v3987_v29 = vpop.f32.mrf.mxu1  ;;  %v3946_v10 = vadd.f32 %v3945_v26, %v3944_v24 }
 0x1a1   : > { %v1097_v30 = vadd.f32 %v5691_v6, %v1083_v25  ;;  %vm2651_vm9 = vcmp.eq.s32.totalorder %v4908_v16, %v2643_v28  ;;  %v3988_v31 = vadd.f32 %v3987_v29, %v3986_v8 }
 0x1a2   : > { %v3810_v35 = vsel %vm2651_vm9, 1.0, %v4582_v21  ;;  %v3989_v36 = vpop.f32.mrf.mxu1  ;;  %v3947_v61 = vpop.f32.mrf.mxu0  ;;  %v870_v13 = vadd.f32 %v5648_v37, %v3946_v10 }
 0x1a3   : > { %v2671_v38 = vpack.c.bf16 %v3810_v35, %v3809_v11  ;;  %v1084_v39 = vadd.f32 %v3988_v31, %v867_v27  ;;  %1106 = vst.msk [vmem:[%s5696_s30 + $0x8] sm:$0xff] %vm1104_vm7, %v1097_v30 }
 0x1a4   : > { %v3990_v34 = vpop.f32.mrf.mxu1  ;;  %v3948_v40 = vpop.f32.mrf.mxu0 }
 0x1a5   : > { %v1098_v32 = vadd.f32 %v5691_v6, %v1084_v39  ;;  %v3991_v42 = vadd.f32 %v3990_v34, %v3989_v36  ;;  %v2775_v1 = vpop.permute.xlu1 %2774  ;;  %v3949_v21 = vadd.f32 %v3948_v40, %v3947_v61  ;;  %4296 = vmatmul.mubr.msk.bf16.gmra.mxu1 %vm811_vm4, %v2671_v38  ;;  %vm1853_vm4 = vcmask 523520  }
 0x1a6   : > { %vm2790_vm12 = vcmp.eq.s32.totalorder %v4908_v16, %v2775_v1  ;;  %vm2791_vm13 = vcmp.eq.s32.totalorder %v4952_v43, %v2775_v1  ;;  %v3992_v44 = vpop.f32.mrf.mxu1  ;;  %v3950_v46 = vpop.f32.mrf.mxu0 }
 0x1a7   : > { %v1085_v48 = vadd.f32 %v3991_v42, %v870_v13  ;;  %v875_v49 = vadd.f32 %v3949_v21, %v5665_v45  ;;  %vm3908_vm14 = vmpackc.low %vm2791_vm13, %vm2789_vm11  ;;  %1107 = vst.msk [vmem:[%s5696_s30 + $0x10] sm:$0xff] %vm1104_vm7, %v1098_v32 }
 0x1a8   : > { %vm3910_vm15 = vmpackc.low %vm2790_vm12, %vm2788_vm10  ;;  %v3993_v37 = vpop.f32.mrf.mxu1  ;;  %3909 = vmatprep.mubr.msk.bf16.mxu0 %vm3908_vm14, %v4583_v53  ;;  %v3951_v15 = vpop.f32.mrf.mxu0 }
 0x1a9   : > { %v1099_v50 = vadd.f32 %v5691_v6, %v1085_v48  ;;  %v3994_v43 = vadd.f32 %v3993_v37, %v3992_v44  ;;  %v3952_v52 = vadd.f32 %v3951_v15, %v3950_v46  ;;  %3911 = vmatmul.mubr.msk.bf16.gmra.mxu0 %vm3910_vm15, %v4583_v53 }
 0x1aa   : > { %v3995_v55 = vpop.f32.mrf.mxu1 }
 0x1ab   : > { %v1086_v56 = vadd.f32 %v3994_v43, %v875_v49  ;;  %v878_v45 = vadd.f32 %v3952_v52, %v5675_v58  ;;  %1108 = vst.msk [vmem:[%s5696_s30 + $0x18] sm:$0xff] %vm1104_vm7, %v1099_v50 }
 0x1ac   : > { %v3996_v16 = vpop.f32.mrf.mxu1 }
 0x1ad   : > { %v1100_v57 = vadd.f32 %v5691_v6, %v1086_v56  ;;  %v3997_v59 = vadd.f32 %v3996_v16, %v3995_v55 }
 0x1ae   : > { %v3998_v60 = vpop.f32.mrf.mxu1  ;;  %v3953_v62 = vpop.f32.mrf.mxu0 }
 0x1af   : > { %v1087_v63 = vadd.f32 %v3997_v59, %v878_v45  ;;  %1109 = vst.msk [vmem:[%s5696_s30 + $0x20] sm:$0xff] %vm1104_vm7, %v1100_v57 }
 0x1b0   : > { %v3999_v0 = vpop.f32.mrf.mxu1  ;;  %v3954_v2 = vpop.f32.mrf.mxu0 }
 0x1b1   : > { %v1101_v53 = vadd.f32 %v5691_v6, %v1087_v63  ;;  %v3955_v51 = vadd.f32 %v3954_v2, %v3953_v62  ;;  %v4000_v3 = vadd.f32 %v3999_v0, %v3998_v60 }
 0x1b2   : > { %v4001_v12 = vpop.f32.mrf.mxu1  ;;  %v3956_v58 = vpop.f32.mrf.mxu0 }
 0x1b3   : > { %v883_v4 = vadd.f32 %v5661_v41, %v3955_v51  ;;  %1110 = vst.msk [vmem:[%s5696_s30 + $0x28] sm:$0xff] %vm1104_vm7, %v1101_v53 }
 0x1b4   : > { %v4002_v5 = vpop.f32.mrf.mxu1  ;;  %v3957_v14 = vpop.f32.mrf.mxu0 }
 0x1b5   : > { %v1088_v7 = vadd.f32 %v4000_v3, %v883_v4  ;;  %v3958_v17 = vadd.f32 %v3957_v14, %v3956_v58  ;;  %v4003_v19 = vadd.f32 %v4002_v5, %v4001_v12 }
 0x1b6   : > { %v4020_v54 = vpop.f32.mrf.mxu1 }
 0x1b7   : > { %v1102_v18 = vadd.f32 %v5691_v6, %v1088_v7  ;;  %v886_v20 = vadd.f32 %v5669_v9, %v3958_v17 }
 0x1b8   : > { %v4021_v47 = vpop.f32.mrf.mxu1 }
 0x1b9   : > { %v1089_v22 = vadd.f32 %v4003_v19, %v886_v20  ;;  %1111 = vst.msk [vmem:[%s5696_s30 + $0x30] sm:$0xff] %vm1104_vm7, %v1102_v18  ;;  %v4022_v1 = vadd.f32 %v4021_v47, %v4020_v54 }
 0x1ba   : > { %v4023_v23 = vpop.f32.mrf.mxu1 }
 0x1bb   : > { %v1103_v41 = vadd.f32 %v5691_v6, %v1089_v22  ;;  %v4065_v8 = vpop.f32.mrf.mxu0 }
 0x1bc   : > { %v4024_v24 = vpop.f32.mrf.mxu1 }
 0x1bd   : > { %1112 = vst.msk [vmem:[%s5696_s30 + $0x38] sm:$0xff] %vm1104_vm7, %v1103_v41  ;;  %v4066_v26 = vpop.f32.mrf.mxu0  ;;  %v4025_v43 = vadd.f32 %v4024_v24, %v4023_v23 }
 0x1be   : > { %v4026_v25 = vpop.f32.mrf.mxu1  ;;  %v4067_v49 = vadd.f32 %v4066_v26, %v4065_v8 }
 0x1bf   : > { %v4068_v29 = vpop.f32.mrf.mxu0 }
 0x1c0   : > { %v4027_v27 = vpop.f32.mrf.mxu1 }
 0x1c1   : > { %v4069_v31 = vpop.f32.mrf.mxu0  ;;  %v4028_v13 = vadd.f32 %v4027_v27, %v4026_v25 }
 0x1c2   : > { %v4029_v28 = vpop.f32.mrf.mxu1  ;;  %v4070_v60 = vadd.f32 %v4069_v31, %v4068_v29 }
 0x1c4   : > { %v4030_v30 = vpop.f32.mrf.mxu1 }
 0x1c5   : > { %v4031_v37 = vadd.f32 %v4030_v30, %v4029_v28 }
 0x1c6   : > { %v4032_v10 = vpop.f32.mrf.mxu1 }
 0x1c8   : > { %v4033_v9 = vpop.f32.mrf.mxu1  ;;  %v4071_v33 = vpop.f32.mrf.mxu0 }
 0x1c9   : > { %v4034_v17 = vadd.f32 %v4033_v9, %v4032_v10 }
 0x1ca   : > { %v4035_v11 = vpop.f32.mrf.mxu1  ;;  %v4072_v36 = vpop.f32.mrf.mxu0 }
 0x1cb   : > { %v4073_v21 = vadd.f32 %v4072_v36, %v4071_v33 }
 0x1cc   : > { %v4036_v35 = vpop.f32.mrf.mxu1  ;;  %v4074_v39 = vpop.f32.mrf.mxu0 }
 0x1cd   : > { %v4037_v24 = vadd.f32 %v4036_v35, %v4035_v11 }
 0x1ce   : > { %v4038_v61 = vpop.f32.mrf.mxu1  ;;  %v4075_v32 = vpop.f32.mrf.mxu0 }
 0x1cf   : > { %v4076_v55 = vadd.f32 %v4075_v32, %v4074_v39 }
 0x1d0   : > { %v4039_v38 = vpop.f32.mrf.mxu1 }
 0x1d1   : > { %v4040_v14 = vadd.f32 %v4039_v38, %v4038_v61 }
 0x1d2   : > { %v4041_v34 = vpop.f32.mrf.mxu1 }
 0x1d4   : > { %v4042_v40 = vpop.f32.mrf.mxu1 }
 0x1d5   : > { %v4043_v47 = vadd.f32 %v4042_v40, %v4041_v34 }
 0x1d6   : > { %v4273_v42 = vpop.f32.mrf.mxu1  ;;  %v4077_v46 = vpop.f32.mrf.mxu0 }
 0x1d7   : > { %v1590_v44 = vadd.f32 %v4273_v42, %v4028_v13 }
 0x1d8   : > { %v1581_v48 = vpop.f32.mrf.mxu1  ;;  %v4078_v57 = vpop.f32.mrf.mxu0 }
 0x1d9   : > { %v1807_v15 = vadd.f32 %v4073_v21, %v1590_v44  ;;  %v1582_v50 = vadd.f32 %v4022_v1, %v1581_v48  ;;  %v4079_v22 = vadd.f32 %v4078_v57, %v4077_v46 }
 0x1da   : > { %v4274_v52 = vpop.f32.mrf.mxu1  ;;  %v4080_v53 = vpop.f32.mrf.mxu0 }
 0x1db   : > { %v1815_v56 = vadd.f32 %v5691_v6, %v1807_v15  ;;  %v1805_v45 = vadd.f32 %v4067_v49, %v1582_v50  ;;  %v1593_v16 = vadd.f32 %v4274_v52, %v4031_v37 }
 0x1dc   : > { %v1584_v59 = vpop.f32.mrf.mxu1  ;;  %v4081_v12 = vpop.f32.mrf.mxu0 }
 0x1dd   : > { %v1808_v62 = vadd.f32 %v4076_v55, %v1593_v16  ;;  %v1585_v63 = vadd.f32 %v4025_v43, %v1584_v59  ;;  %1833 = vrot.lane.b32.xlu1 %v1815_v56, %s4584_s6  ;;  %v1813_v0 = vadd.f32 %v5691_v6, %v1805_v45  ;;  %v4082_v31 = vadd.f32 %v4081_v12, %v4080_v53 }
 0x1de   : > { %v4083_v3 = vpop.f32.mrf.mxu0 }
 0x1df   : > { %v1806_v2 = vadd.f32 %v4070_v60, %v1585_v63  ;;  %v1816_v51 = vadd.f32 %v5691_v6, %v1808_v62 }
 0x1e0   : > { %v4084_v4 = vpop.f32.mrf.mxu0 }
 0x1e1   : > { %1835 = vrot.lane.b32.xlu0 %v1816_v51, %s4584_s6  ;;  %1829 = vrot.lane.b32.xlu1 %v1813_v0, %s4584_s6  ;;  %v1814_v58 = vadd.f32 %v5691_v6, %v1806_v2  ;;  %v4085_v54 = vadd.f32 %v4084_v4, %v4083_v3 }
 0x1e2   : > { %v4086_v5 = vpop.f32.mrf.mxu0 }
 0x1e4   : > { %v4087_v19 = vpop.f32.mrf.mxu0 }
 0x1e5   : > { %1831 = vrot.lane.b32.xlu0 %v1814_v58, %s4584_s6  ;;  %v4088_v25 = vadd.f32 %v4087_v19, %v4086_v5 }
 0x1e8   : > { %v5748_v29 = vpop.f32.mrf.mxu0 }
 0x1ea   : > { %v2330_v35 = vpop.f32.mrf.mxu0 }
 0x1ec   : > { %v4284_v34 = vpop.f32.mrf.mxu0 }
 0x1ee   : > { %v2333_v13 = vpop.f32.mrf.mxu0 }
 0x1f0   : > { %v4277_v7 = vpop.f32.mrf.mxu1 }
 0x1f1   : > { %v1606_v18 = vadd.f32 %v4277_v7, %v4040_v14 }
 0x1f2   : > { %v1597_v20 = vpop.f32.mrf.mxu1 }
 0x1f3   : > { %v1811_v23 = vadd.f32 %v4085_v54, %v1606_v18  ;;  %v1598_v41 = vadd.f32 %v4034_v17, %v1597_v20 }
 0x1f4   : > { %v4278_v8 = vpop.f32.mrf.mxu1 }
 0x1f5   : > { %v1819_v26 = vadd.f32 %v5691_v6, %v1811_v23  ;;  %v1809_v27 = vadd.f32 %v4079_v22, %v1598_v41  ;;  %v1609_v28 = vadd.f32 %v4278_v8, %v4043_v47 }
 0x1f6   : > { %v1600_v30 = vpop.f32.mrf.mxu1 }
 0x1f7   : > { %v1812_v10 = vadd.f32 %v4088_v25, %v1609_v28  ;;  %v1601_v9 = vadd.f32 %v4037_v24, %v1600_v30  ;;  %1841 = vrot.lane.b32.xlu1 %v1819_v26, %s4584_s6  ;;  %v1817_v36 = vadd.f32 %v5691_v6, %v1809_v27 }
 0x1f8   : > { %v4105_v33 = vpop.f32.mrf.mxu1 }
 0x1f9   : > { %v1810_v61 = vadd.f32 %v4082_v31, %v1601_v9  ;;  %v1820_v11 = vadd.f32 %v5691_v6, %v1812_v10 }
 0x1fa   : > { %v4106_v38 = vpop.f32.mrf.mxu1 }
 0x1fb   : > { %1843 = vrot.lane.b32.xlu0 %v1820_v11, %s4584_s6  ;;  %1837 = vrot.lane.b32.xlu1 %v1817_v36, %s4584_s6  ;;  %v1818_v39 = vadd.f32 %v5691_v6, %v1810_v61  ;;  %v4107_v2 = vadd.f32 %v4106_v38, %v4105_v33 }
 0x1fc   : > { %v4108_v40 = vpop.f32.mrf.mxu1 }
 0x1fd   : > { %v2331_v58 = vadd.f32 %v4107_v2, %v2330_v35 }
 0x1fe   : > { %v4109_v32 = vpop.f32.mrf.mxu1 }
 0x1ff   : > { %1839 = vrot.lane.b32.xlu0 %v1818_v39, %s4584_s6  ;;  %v4110_v3 = vadd.f32 %v4109_v32, %v4108_v40 }
 0x201   : > { %v2334_v18 = vadd.f32 %v4110_v3, %v2333_v13 }
 0x202   : > { %v5757_v42 = vpop.f32.mrf.mxu0 }
 0x204   : > { %v5759_v21 = vpop.f32.mrf.mxu0 }
 0x206   : > { %v4111_v1 = vpop.f32.mrf.mxu1  ;;  %v5761_v48 = vpop.f32.mrf.mxu0 }
 0x208   : > { %v4112_v44 = vpop.f32.mrf.mxu1  ;;  %v5763_v15 = vpop.f32.mrf.mxu0 }
 0x209   : > { %v4113_v41 = vadd.f32 %v4112_v44, %v4111_v1 }
 0x20a   : > { %v4114_v46 = vpop.f32.mrf.mxu1 }
 0x20b   : > { %v2339_v26 = vadd.f32 %v5748_v29, %v4113_v41 }
 0x20c   : > { %v4115_v49 = vpop.f32.mrf.mxu1 }
 0x20d   : > { %v4116_v27 = vadd.f32 %v4115_v49, %v4114_v46 }
 0x20e   : > { %v4117_v37 = vpop.f32.mrf.mxu1 }
 0x20f   : > { %v2342_v36 = vadd.f32 %v4284_v34, %v4116_v27 }
 0x210   : > { %v4118_v50 = vpop.f32.mrf.mxu1 }
 0x211   : > { %v4119_v38 = vadd.f32 %v4118_v50, %v4117_v37 }
 0x212   : > { %v4120_v43 = vpop.f32.mrf.mxu1  ;;  %v5765_v52 = vpop.f32.mrf.mxu0 }
 0x213   : > { %v2347_v44 = vadd.f32 %v4119_v38, %v5759_v21 }
 0x214   : > { %v4121_v55 = vpop.f32.mrf.mxu1  ;;  %v5767_v56 = vpop.f32.mrf.mxu0 }
 0x215   : > { %v4122_v34 = vadd.f32 %v4121_v55, %v4120_v43 }
 0x216   : > { %v5771_v16 = vpop.f32.mrf.mxu0 }
 0x217   : > { %v5769_v45 = vpop.f32.mrf.mxu1 }
 0x218   : > { %v5773_v59 = vpop.f32.mrf.mxu0 }
 0x219   : > { %v4124_v57 = vpop.f32.mrf.mxu1 }
 0x21b   : > { %v5775_v60 = vpop.f32.mrf.mxu1  ;;  %v5777_v62 = vpop.f32.mrf.mxu0 }
 0x21d   : > { %v5779_v63 = vpop.f32.mrf.mxu1  ;;  %v5781_v0 = vpop.f32.mrf.mxu0 }
 0x21e   : > { %v4128_v55 = vadd.f32 %v5779_v63, %v5775_v60 }
 0x21f   : > { %v5783_v53 = vpop.f32.mrf.mxu0 }
 0x220   : > { %v4150_v51 = vpop.f32.mrf.mxu1 }
 0x221   : > { %v5785_v5 = vpop.f32.mrf.mxu0 }
 0x222   : > { %v4151_v12 = vpop.f32.mrf.mxu1  ;;  %v4201_v38 = vadd.f32 %v5785_v5, %v5783_v53 }
 0x223   : > { %v4152_v4 = vadd.f32 %v4151_v12, %v4150_v51  ;;  %v2350_v12 = vadd.f32 %v4122_v34, %v5763_v15 }
 0x224   : > { %v4153_v14 = vpop.f32.mrf.mxu1 }
 0x225   : > { %v2554_v7 = vadd.f32 %v4152_v4, %v2331_v58  ;;  %v5787_v17 = vpop.f32.mrf.mxu0  ;;  %v4125_v58 = vadd.f32 %v4124_v57, %v5769_v45 }
 0x226   : > { %v4154_v54 = vpop.f32.mrf.mxu1 }
 0x227   : > { %v2562_v19 = vadd.f32 %v5691_v6, %v2554_v7  ;;  %v4155_v20 = vadd.f32 %v4154_v54, %v4153_v14  ;;  %v5791_v22 = vpop.f32.mrf.mxu0  ;;  %v2355_v43 = vadd.f32 %v5757_v42, %v4125_v58 }
 0x229   : > { %v2555_v47 = vadd.f32 %v4155_v20, %v2334_v18  ;;  %2578 = vrot.lane.b32.xlu1 %v2562_v19, %s4585_s7  ;;  %v5795_v24 = vpop.f32.mrf.mxu0 }
 0x22b   : > { %v2563_v23 = vadd.f32 %v5691_v6, %v2555_v47  ;;  %v5798_v28 = vpop.f32.mrf.mxu0  ;;  %v2358_v47 = vadd.f32 %v5761_v48, %v4128_v55  ;;  %v4198_v48 = vadd.f32 %v5781_v0, %v5777_v62 }
 0x22c   : > { %v4207_v55 = vadd.f32 %v5798_v28, %v5795_v24 }
 0x22d   : > { %2580 = vrot.lane.b32.xlu0 %v2563_v23, %s4585_s7 }
 0x22f   : > { %v4156_v8 = vpop.f32.mrf.mxu1 }
 0x231   : > { %v4157_v25 = vpop.f32.mrf.mxu1 }
 0x232   : > { %v4158_v30 = vadd.f32 %v4157_v25, %v4156_v8 }
 0x233   : > { %v4159_v31 = vpop.f32.mrf.mxu1 }
 0x234   : > { %v2556_v10 = vadd.f32 %v4158_v30, %v2339_v26  ;;  %v5800_v9 = vpop.f32.mrf.mxu0 }
 0x235   : > { %v4160_v33 = vpop.f32.mrf.mxu1 }
 0x236   : > { %v2564_v61 = vadd.f32 %v5691_v6, %v2556_v10  ;;  %v4161_v11 = vadd.f32 %v4160_v33, %v4159_v31  ;;  %v5803_v35 = vpop.f32.mrf.mxu0  ;;  %v4192_v31 = vadd.f32 %v5767_v56, %v5765_v52 }
 0x238   : > { %v2557_v39 = vadd.f32 %v4161_v11, %v2342_v36  ;;  %v5805_v40 = vpop.f32.mrf.mxu0  ;;  %2582 = vrot.lane.b32.xlu1 %v2564_v61, %s4585_s7 }
 0x239   : > { %v4162_v29 = vpop.f32.mrf.mxu1 }
 0x23a   : > { %v5808_v13 = vpop.f32.mrf.mxu0  ;;  %v2565_v32 = vadd.f32 %v5691_v6, %v2557_v39 }
 0x23b   : > { %v4163_v1 = vpop.f32.mrf.mxu1  ;;  %v4213_v24 = vadd.f32 %v5808_v13, %v5805_v40 }
 0x23c   : > { %v4164_v46 = vadd.f32 %v4163_v1, %v4162_v29  ;;  %2584 = vrot.lane.b32.xlu0 %v2565_v32, %s4585_s7  ;;  %v4195_v29 = vadd.f32 %v5773_v59, %v5771_v16 }
 0x23d   : > { %v4165_v49 = vpop.f32.mrf.mxu1  ;;  %v4235_v2 = vpop.f32.mrf.mxu0 }
 0x23e   : > { %v2558_v37 = vadd.f32 %v4164_v46, %v2347_v44 }
 0x23f   : > { %v4166_v50 = vpop.f32.mrf.mxu1  ;;  %v4236_v51 = vpop.f32.mrf.mxu0 }
 0x240   : > { %v2566_v3 = vadd.f32 %v5691_v6, %v2558_v37  ;;  %v4167_v4 = vadd.f32 %v4166_v50, %v4165_v49  ;;  %v4237_v39 = vadd.f32 %v4236_v51, %v4235_v2 }
 0x241   : > { %v4168_v14 = vpop.f32.mrf.mxu1  ;;  %v4238_v7 = vpop.f32.mrf.mxu0 }
 0x242   : > { %v2559_v54 = vadd.f32 %v4167_v4, %v2350_v12  ;;  %2586 = vrot.lane.b32.xlu1 %v2566_v3, %s4585_s7  ;;  %v4204_v3 = vadd.f32 %v5791_v22, %v5787_v17 }
 0x243   : > { %v4169_v21 = vpop.f32.mrf.mxu1  ;;  %v4239_v15 = vpop.f32.mrf.mxu0 }
 0x244   : > { %v4170_v18 = vadd.f32 %v4169_v21, %v4168_v14  ;;  %v2567_v19 = vadd.f32 %v5691_v6, %v2559_v54  ;;  %v4240_v49 = vadd.f32 %v4239_v15, %v4238_v7 }
 0x245   : > { %v4171_v45 = vpop.f32.mrf.mxu1  ;;  %v4241_v42 = vpop.f32.mrf.mxu0 }
 0x246   : > { %v2560_v57 = vadd.f32 %v4170_v18, %v2355_v43  ;;  %2588 = vrot.lane.b32.xlu0 %v2567_v19, %s4585_s7  ;;  %v4210_v18 = vadd.f32 %v5803_v35, %v5800_v9 }
 0x247   : > { %v4172_v20 = vpop.f32.mrf.mxu1  ;;  %v4242_v63 = vpop.f32.mrf.mxu0 }
 0x248   : > { %v2568_v23 = vadd.f32 %v5691_v6, %v2560_v57  ;;  %v4173_v41 = vadd.f32 %v4172_v20, %v4171_v45  ;;  %v4243_v10 = vadd.f32 %v4242_v63, %v4241_v42 }
 0x249   : > { %v4244_v26 = vpop.f32.mrf.mxu0 }
 0x24a   : > { %v2561_v8 = vadd.f32 %v4173_v41, %v2358_v47  ;;  %2590 = vrot.lane.b32.xlu1 %v2568_v23, %s4585_s7 }
 0x24b   : > { %v4245_v61 = vpop.f32.mrf.mxu0 }
 0x24c   : > { %v2569_v60 = vadd.f32 %v5691_v6, %v2561_v8  ;;  %v4246_v56 = vadd.f32 %v4245_v61, %v4244_v26 }
 0x24e   : > { %2592 = vrot.lane.b32.xlu0 %v2569_v60, %s4585_s7 }
 0x24f   : > { %v1834_v25 = vpop.permute.xlu1 %1833 }
 0x250   : > { %1856 = vst.msk [vmem:[%s5696_s30 + $0x10] sm:$0xff] %vm1853_vm4, %v1834_v25 }
 0x253   : > { %v1830_v27 = vpop.permute.xlu1 %1829  ;;  %v4293_v30 = vpop.f32.mrf.mxu1 }
 0x254   : > { %1854 = vst.msk [vmem:[%s5696_s30] sm:$0xff] %vm1853_vm4, %v1830_v27  ;;  %v3088_v33 = vadd.f32 %v4293_v30, %v4198_v48  ;;  %v1836_v36 = vpop.permute.xlu0 %1835 }
 0x255   : > { %1857 = vst.msk [vmem:[%s5696_s30 + $0x18] sm:$0xff] %vm1853_vm4, %v1836_v36  ;;  %v3079_v11 = vpop.f32.mrf.mxu1 }
 0x256   : > { %v3305_v62 = vadd.f32 %v4243_v10, %v3088_v33  ;;  %v3080_v0 = vadd.f32 %v4192_v31, %v3079_v11 }
 0x257   : > { %v4294_v52 = vpop.f32.mrf.mxu1  ;;  %v4247_v53 = vpop.f32.mrf.mxu0 }
 0x258   : > { %v3313_v32 = vadd.f32 %v5691_v6, %v3305_v62  ;;  %v3303_v1 = vadd.f32 %v4237_v39, %v3080_v0  ;;  %v3091_v44 = vadd.f32 %v4294_v52, %v4201_v38  ;;  %v1832_v34 = vpop.permute.xlu0 %1831 }
 0x259   : > { %1855 = vst.msk [vmem:[%s5696_s30 + $0x8] sm:$0xff] %vm1853_vm4, %v1832_v34  ;;  %v3082_v46 = vpop.f32.mrf.mxu1  ;;  %v4248_v2 = vpop.f32.mrf.mxu0 }
 0x25a   : > { %v3306_v37 = vadd.f32 %v4246_v56, %v3091_v44  ;;  %v3083_v50 = vadd.f32 %v4195_v29, %v3082_v46  ;;  %3331 = vrot.lane.b32.xlu1 %v3313_v32, %s4586_s8  ;;  %v3311_v5 = vadd.f32 %v5691_v6, %v3303_v1  ;;  %v4249_v7 = vadd.f32 %v4248_v2, %v4247_v53 }
 0x25b   : > { %v4250_v12 = vpop.f32.mrf.mxu0 }
 0x25c   : > { %v3304_v16 = vadd.f32 %v4240_v49, %v3083_v50  ;;  %v3314_v59 = vadd.f32 %v5691_v6, %v3306_v37 }
 0x25d   : > { %v4251_v4 = vpop.f32.mrf.mxu0 }
 0x25e   : > { %3333 = vrot.lane.b32.xlu0 %v3314_v59, %s4586_s8  ;;  %3327 = vrot.lane.b32.xlu1 %v3311_v5, %s4586_s8  ;;  %v3312_v51 = vadd.f32 %v5691_v6, %v3304_v16  ;;  %v4252_v45 = vadd.f32 %v4251_v4, %v4250_v12 }
 0x262   : > { %3329 = vrot.lane.b32.xlu0 %v3312_v51, %s4586_s8 }
 0x265   : > { %v4297_v58 = vpop.f32.mrf.mxu1 }
 0x266   : > { %v3104_v57 = vadd.f32 %v4297_v58, %v4210_v18 }
 0x267   : > { %v3095_v14 = vpop.f32.mrf.mxu1 }
 0x268   : > { %v3096_v54 = vadd.f32 %v4204_v3, %v3095_v14 }
 0x269   : > { %v4298_v21 = vpop.f32.mrf.mxu1  ;;  %v4253_v43 = vpop.f32.mrf.mxu0 }
 0x26a   : > { %v3307_v19 = vadd.f32 %v4249_v7, %v3096_v54  ;;  %v1842_v15 = vpop.permute.xlu1 %1841  ;;  %v3107_v60 = vadd.f32 %v4298_v21, %v4213_v24 }
 0x26b   : > { %1860 = vst.msk [vmem:[%s5696_s30 + $0x30] sm:$0xff] %vm1853_vm4, %v1842_v15  ;;  %v3098_v17 = vpop.f32.mrf.mxu1  ;;  %v4254_v22 = vpop.f32.mrf.mxu0 }
 0x26c   : > { %v3315_v20 = vadd.f32 %v5691_v6, %v3307_v19  ;;  %v3099_v47 = vadd.f32 %v4207_v55, %v3098_v17  ;;  %v4255_v23 = vadd.f32 %v4254_v22, %v4253_v43 }
 0x26d   : > { %v4256_v41 = vpop.f32.mrf.mxu0  ;;  %v1844_v42 = vpop.permute.xlu0 %1843 }
 0x26e   : > { %v3308_v28 = vadd.f32 %v4252_v45, %v3099_v47  ;;  %v3309_v9 = vadd.f32 %v4255_v23, %v3104_v57  ;;  %3335 = vrot.lane.b32.xlu1 %v3315_v20, %s4586_s8  ;;  %v1838_v35 = vpop.permute.xlu1 %1837  ;;  %1861 = vst.msk [vmem:[%s5696_s30 + $0x38] sm:$0xff] %vm1853_vm4, %v1844_v42 }
 0x26f   : > { %1858 = vst.msk [vmem:[%s5696_s30 + $0x20] sm:$0xff] %vm1853_vm4, %v1838_v35  ;;  %v4257_v8 = vpop.f32.mrf.mxu0 }
 0x270   : > { %v3316_v63 = vadd.f32 %v5691_v6, %v3308_v28  ;;  %v3317_v40 = vadd.f32 %v5691_v6, %v3309_v9  ;;  %v4258_v13 = vadd.f32 %v4257_v8, %v4256_v41 }
 0x271   : > { %v1840_v26 = vpop.permute.xlu0 %1839 }
 0x272   : > { %v3310_v25 = vadd.f32 %v4258_v13, %v3107_v60  ;;  %3337 = vrot.lane.b32.xlu0 %v3316_v63, %s4586_s8  ;;  %3339 = vrot.lane.b32.xlu1 %v3317_v40, %s4586_s8  ;;  %1859 = vst.msk [vmem:[%s5696_s30 + $0x28] sm:$0xff] %vm1853_vm4, %v1840_v26 }
 0x274   : > { %v3318_v48 = vadd.f32 %v5691_v6, %v3310_v25 }
 0x276   : > { %3341 = vrot.lane.b32.xlu0 %v3318_v48, %s4586_s8 }
 0x29b   : > { %v2579_v27 = vpop.permute.xlu1 %2578 }
 0x29c   : > { %2603 = vst.msk [vmem:[%s5696_s30] sm:$0xff] %vm2602_vm0, %v2579_v27 }
 0x29f   : > { %v2581_v30 = vpop.permute.xlu0 %2580 }
 0x2a0   : > { %2604 = vst.msk [vmem:[%s5696_s30 + $0x8] sm:$0xff] %vm2602_vm0, %v2581_v30 }
 0x2aa   : > { %v2583_v31 = vpop.permute.xlu1 %2582 }
 0x2ab   : > { %2605 = vst.msk [vmem:[%s5696_s30 + $0x10] sm:$0xff] %vm2602_vm0, %v2583_v31 }
 0x2ae   : > { %v2585_v10 = vpop.permute.xlu0 %2584 }
 0x2af   : > { %2606 = vst.msk [vmem:[%s5696_s30 + $0x18] sm:$0xff] %vm2602_vm0, %v2585_v10 }
 0x2b4   : > { %v2587_v6 = vpop.permute.xlu1 %2586 }
 0x2b5   : > { %2607 = vst.msk [vmem:[%s5696_s30 + $0x20] sm:$0xff] %vm2602_vm0, %v2587_v6 }
 0x2b8   : > { %v2589_v33 = vpop.permute.xlu0 %2588 }
 0x2b9   : > { %2608 = vst.msk [vmem:[%s5696_s30 + $0x28] sm:$0xff] %vm2602_vm0, %v2589_v33 }
 0x2bc   : > { %v2591_v36 = vpop.permute.xlu1 %2590 }
 0x2bd   : > { %2609 = vst.msk [vmem:[%s5696_s30 + $0x30] sm:$0xff] %vm2602_vm0, %v2591_v36 }
 0x2c0   : > { %v2593_v61 = vpop.permute.xlu0 %2592 }
 0x2c1   : > { %2610 = vst.msk [vmem:[%s5696_s30 + $0x38] sm:$0xff] %vm2602_vm0, %v2593_v61 }
 0x2cc   : > { %v3332_v11 = vpop.permute.xlu1 %3331 }
 0x2cd   : > { %3354 = vst.msk [vmem:[%s5696_s30 + $0x10] sm:$0xff] %vm3351_vm1, %v3332_v11 }
 0x2d0   : > { %v3328_v38 = vpop.permute.xlu1 %3327  ;;  %v3334_v39 = vpop.permute.xlu0 %3333 }
 0x2d1   : > { %3352 = vst.msk [vmem:[%s5696_s30] sm:$0xff] %vm3351_vm1, %v3328_v38  ;;  %3355 = vst.msk [vmem:[%s5696_s30 + $0x18] sm:$0xff] %vm3351_vm1, %v3334_v39 }
 0x2d4   : > { %v3330_v62 = vpop.permute.xlu0 %3329 }
 0x2d5   : > { %3353 = vst.msk [vmem:[%s5696_s30 + $0x8] sm:$0xff] %vm3351_vm1, %v3330_v62 }
 0x2e0   : > { %v3336_v0 = vpop.permute.xlu1 %3335 }
 0x2e1   : > { %3356 = vst.msk [vmem:[%s5696_s30 + $0x20] sm:$0xff] %vm3351_vm1, %v3336_v0 }
 0x2e4   : > { %v3340_v29 = vpop.permute.xlu1 %3339  ;;  %v3338_v52 = vpop.permute.xlu0 %3337 }
 0x2e5   : > { %3358 = vst.msk [vmem:[%s5696_s30 + $0x30] sm:$0xff] %vm3351_vm1, %v3340_v29  ;;  %3357 = vst.msk [vmem:[%s5696_s30 + $0x28] sm:$0xff] %vm3351_vm1, %v3338_v52 }
 0x2e8   : > { %v3342_v56 = vpop.permute.xlu0 %3341 }
 0x2e9   : > { %3359 = vst.msk [vmem:[%s5696_s30 + $0x38] sm:$0xff] %vm3351_vm1, %v3342_v56 }
 0x2ea   : > { %4530 = shalt.err (!%p4527_p5)
}
 0x2eb   : > { %s4531_s25 = scalar_lea.hbm %s5911_s13, 1024  ;;  %s4535_s6 = scalar_lea.hbm %s5963_s5, 2048 }
 0x2ec   : > { %p4532_p7 = scmp.ne.s32.totalorder %s5911_s13, %s4531_s25  ;;  %p4536_p12 = scmp.lt.s32.totalorder %s5911_s13, %s5963_s5 }
 0x2ed   : > { %p4537_p13 = scmp.lt.s32.totalorder %s4535_s6, %s4531_s25 }
 0x2ee   : > { %p4533_p10 = pnand %p4532_p7, %p4658_p6 }
 0x2ef   : > { %p4538_p0 = por %p4537_p13, %p4536_p12 }
 0x2f0   : > { %p4534_p11 = pneg %p4533_p10 }
 0x2f2   : > { %p4539_p1 = pnand %p4538_p0, %p4534_p11 }
 0x2f4   : > { %4542 = shalt.err (!%p4539_p1)
}
 0x2f5   : > { %s4588_s23 = smov 128   ;;  %s4589_s10 = smov 8  }
 0x2f6   : > { %4299 = dma.vmem_to_hbm [thread:$0]  (%p4658_p6), %s5913_s9, 1024, %s5911_s13, %s3361_s22, %s4588_s23, %s4588_s23, %s4589_s10  }
 0x2f7 PF: > { %s3389_s11 = sand.u32 1, %s4565_s18   ;;  %p4302_p2 = pnand %p3444_p9, %p4662_p8 }
 0x2f8   : > { %s3390_s14 = scalar_lea.sflag [#allocation4], %s3389_s11 }
 0x2f9   : > { %p4303_p3 = pneg %p4302_p2 }
 0x2fb   : > { %4560 = dma.done.wait (%p4303_p3), %s3390_s14, 1024  }
 0x2fc   : > { %4562 = vsyncadd (%p4303_p3), %s3390_s14, 4294966272  ;;  %p15_p4 = scmp.ge.s32.totalorder %s4643_s24, 4   ;;  %s5966_s18 = smov %s4569_s19 }
 0x2fd   : > { %s5967_s19 = smov %s4573_s20  ;;  %s5968_s20 = smov %s4656_s27 }
 0x2fe   : > { %s5969_s21 = smov %s4643_s24  ;;  %17 = sbr.rel (!%p15_p4) target bundleno = 3 (0x3), region = 121 }
 0x303   :  { %3395 = vsyncpa [#allocation4], 1 }
 0x304   :  { %3397 = vsyncpa [#allocation4 + $0x1], 1 }

</bundles_post_ra>
